<compile_context>
chip_gen: v5e
topology: v5e:2x2
jax: 0.10.0
libtpu: 0.0.40
codegen_flags: <defaults>
</compile_context>

<pallas_src>
import jax
import jax.numpy as jnp
from jax import lax
from jax.experimental import pallas as pl
from jax.experimental.pallas import tpu as pltpu

_LANE = 128


def _round_up(x, m):
    return (x + m - 1) // m * m


def _pad2(a, rows, cols):
    r, c = a.shape
    if r == rows and c == cols:
        return a
    return jnp.pad(a, ((0, rows - r), (0, cols - c)))


def _default_compute_dtype():
    # bf16 weights/activations (with f32 accumulation and an f32 first layer)
    # are a free win on v5e/v6e/v7x; fall back to f32 anywhere else.
    try:
        kind = jax.devices()[0].device_kind.lower()
    except Exception:
        return jnp.float32
    return jnp.bfloat16 if any(v in kind for v in ("v5", "v6", "v7")) else jnp.float32


def _plan_batch(B, batch_tile):
    """Pick (tile, padded_B, grid). Tiles are multiples of 8; multi-step grids
    use multiples of 128 so every output block is a full-lane (1, tile) row."""
    if batch_tile is None:
        if B <= 128:
            batch_tile = _round_up(B, 8)          # single tile, minimal padding
        else:
            # ~4 grid steps: overlaps x/out DMA with compute and lets the
            # "parallel" batch axis shard across v7x's two TensorCores, while
            # 128..1024-row tiles amortize per-step overhead.
            batch_tile = max(128, min(1024, _round_up(-(-B // 4), 128)))
    batch_tile = max(8, _round_up(int(batch_tile), 8))
    if batch_tile < B:
        batch_tile = _round_up(batch_tile, _LANE)
    if batch_tile >= B:
        batch_tile = _round_up(B, 8)              # single full-batch tile
    Bp = _round_up(B, batch_tile)
    return batch_tile, Bp, Bp // batch_tile


def re_discriminator_kernel(x1_ref, x2_ref,
                            nw1_ref, nb1_ref, nw2_ref, nb2_ref,
                            nw3_ref, nb3_ref, nw4_ref, nb4_ref,
                            rw1_ref, rb1_ref, rw2_ref, rb2_ref,
                            o_ref, xpad_ref):
    bt, nz = x1_ref.shape

    # Stack the x1/x2 tiles along the sublane (batch) dim and zero-pad the tiny
    # feature dim (nz -> 128 lanes) in VMEM only.  The scratch is re-zeroed
    # every step so correctness does not depend on how the parallel grid axis
    # is split across TensorCores; the zero-fill is a few hundred vreg stores.
    xpad_ref[...] = jnp.zeros_like(xpad_ref)
    xpad_ref[:bt, :nz] = x1_ref[...].astype(xpad_ref.dtype)
    xpad_ref[bt:, :nz] = x2_ref[...].astype(xpad_ref.dtype)
    x = xpad_ref[...]                                     # (2*bt, nz_p)

    def layer(h, w_ref, b_ref):
        # MXU matmul with f32 accumulation; bias add + ReLU on the f32
        # accumulator.  The (1, N) f32 bias is sublane-broadcast at point of
        # use (no hoisted broadcast_to -> no vreg-file blowup).
        acc = jnp.dot(h.astype(w_ref.dtype), w_ref[...],
                      preferred_element_type=jnp.float32)
        return jnp.maximum(acc + b_ref[...], 0.0)

    # Shared `net`, run once on the stacked (2*bt, .) slab, then fold halves.
    h = layer(x, nw1_ref, nb1_ref)          # first layer weights kept f32
    h = layer(h, nw2_ref, nb2_ref)
    h = layer(h, nw3_ref, nb3_ref)
    h = layer(h, nw4_ref, nb4_ref)
    hsum = h[:bt, :] + h[bt:, :]            # net(x1) + net(x2)   (bt, nh_p) f32

    # 're' head: Linear -> ReLU, then the final 1-wide Linear emitted as a
    # lane-dense row:  (1, nh_p) x (bt, nh_p)^T -> (1, bt)   (unmasked vst).
    g = layer(hsum, rw1_ref, rb1_ref)
    out = lax.dot_general(rw2_ref[...], g.astype(rw2_ref.dtype),
                          dimension_numbers=(((1,), (1,)), ((), ())),
                          preferred_element_type=jnp.float32)
    out = out + rb2_ref[0, 0]
    o_ref[...] = out.astype(o_ref.dtype)


def re_discriminator_forward(x1, x2, params, *, batch_tile=None, compute_dtype=None):
    """params = (nw1, nb1, nw2, nb2, nw3, nb3, nw4, nb4, rw1, rb1, rw2, rb2).

    Weights are stored as (in_features, out_features) so the kernel computes
    y = x @ W + b (equivalent to PyTorch's x @ W_pt.T + b); biases are (1, out).
    """
    assert x1.shape == x2.shape and x1.ndim == 2
    B, nz = x1.shape
    nw1, nb1, nw2, nb2, nw3, nb3, nw4, nb4, rw1, rb1, rw2, rb2 = params
    nh = nw1.shape[1]
    out_dtype = x1.dtype

    wdt = _default_compute_dtype() if compute_dtype is None else compute_dtype

    nz_p = _round_up(nz, _LANE)
    nh_p = _round_up(nh, _LANE)

    bt, Bp, grid = _plan_batch(B, batch_tile)

    # Inputs stay unpadded along the feature dim; the batch is padded only when
    # it is not already a multiple of the tile.
    if Bp != B:
        x1 = jnp.pad(x1, ((0, Bp - B), (0, 0)))
        x2 = jnp.pad(x2, ((0, Bp - B), (0, 0)))

    # Weights/biases padded to 128-lane layers (tiny) and kept VMEM-resident
    # across the whole batch grid via constant index maps.  Biases stay f32
    # (they are added to the f32 MXU accumulator).
    def pw(w, r, c, dt):
        return _pad2(w, r, c).astype(dt)

    def pb(b, c):
        return _pad2(b.reshape(1, -1), 1, c).astype(jnp.float32)

    padded = [
        pw(nw1, nz_p, nh_p, jnp.float32),   # first layer stays f32 (input parity)
        pb(nb1, nh_p),
        pw(nw2, nh_p, nh_p, wdt), pb(nb2, nh_p),
        pw(nw3, nh_p, nh_p, wdt), pb(nb3, nh_p),
        pw(nw4, nh_p, nh_p, wdt), pb(nb4, nh_p),
        pw(rw1, nh_p, nh_p, wdt), pb(rb1, nh_p),
        pw(rw2.T, 1, nh_p, wdt),            # final weight as a lane-dense row
    ]
    rb2_s = jnp.asarray(rb2, jnp.float32).reshape(1, 1)

    def resident(shape):
        # Full-array block, same block index every step -> stays in VMEM
        # across the batch grid (no per-step re-DMA).
        return pl.BlockSpec(shape, lambda i: (0, 0))

    out_row = pl.pallas_call(
        re_discriminator_kernel,
        out_shape=jax.ShapeDtypeStruct((1, Bp), out_dtype),
        grid_spec=pltpu.PrefetchScalarGridSpec(
            num_scalar_prefetch=0,
            grid=(grid,),
            in_specs=[
                pl.BlockSpec((bt, nz), lambda i: (i, 0)),      # x1 tile (unpadded)
                pl.BlockSpec((bt, nz), lambda i: (i, 0)),      # x2 tile (unpadded)
            ] + [resident(p.shape) for p in padded] + [
                pl.BlockSpec(memory_space=pltpu.MemorySpace.SMEM),  # rb2 scalar
            ],
            out_specs=pl.BlockSpec((1, bt), lambda i: (0, i)),
            scratch_shapes=[pltpu.VMEM((2 * bt, nz_p), x1.dtype)],
        ),
        compiler_params=pltpu.CompilerParams(
            dimension_semantics=("parallel",)),
    )(x1, x2, *padded, rb2_s)

    return out_row[0, :B].reshape(B, 1)


def init_params(key, nhidden, nz, dtype=jnp.float32):
    """PyTorch nn.Linear default init: U[-1/sqrt(in), 1/sqrt(in)] for W and b."""
    dims = [(nz, nhidden), (nhidden, nhidden), (nhidden, nhidden), (nhidden, nhidden),  # net
            (nhidden, nhidden), (nhidden, 1)]                                           # re
    params = []
    for (din, dout) in dims:
        key, kw, kb = jax.random.split(key, 3)
        bound = 1.0 / (din ** 0.5)
        w = jax.random.uniform(kw, (din, dout), dtype, minval=-bound, maxval=bound)
        b = jax.random.uniform(kb, (1, dout), dtype, minval=-bound, maxval=bound)
        params += [w, b]
    return tuple(params)


def reference_forward(x1, x2, params):
    nw1, nb1, nw2, nb2, nw3, nb3, nw4, nb4, rw1, rb1, rw2, rb2 = params

    def net(x):
        h = jnp.maximum(x @ nw1 + nb1, 0.0)
        h = jnp.maximum(h @ nw2 + nb2, 0.0)
        h = jnp.maximum(h @ nw3 + nb3, 0.0)
        h = jnp.maximum(h @ nw4 + nb4, 0.0)
        return h

    h = net(x1) + net(x2)
    h = jnp.maximum(h @ rw1 + rb1, 0.0)
    return h @ rw2 + rb2


if __name__ == "__main__":
    nhidden, nz = 32, 8
    batch = 256                       # -> 2 grid steps of 128 rows

    key = jax.random.PRNGKey(0)
    key, k1, k2 = jax.random.split(key, 3)
    x1 = jax.random.normal(k1, (batch, nz), dtype=jnp.float32)
    x2 = jax.random.normal(k2, (batch, nz), dtype=jnp.float32)
    params = init_params(key, nhidden, nz)

    ref = reference_forward(x1, x2, params)

    # Exact-parity path: f32 weights/activations everywhere.
    out_f32 = jax.block_until_ready(
        re_discriminator_forward(x1, x2, params, compute_dtype=jnp.float32))
    assert out_f32.shape == (batch, 1)
    assert jnp.allclose(out_f32, ref, atol=1e-4, rtol=1e-4)

    # Default path: bf16 weights/activations on v5e/v6e/v7x (f32 accumulation,
    # f32 first layer), f32 elsewhere.
    out_def = jax.block_until_ready(re_discriminator_forward(x1, x2, params))
    assert out_def.shape == (batch, 1)
    assert jnp.allclose(out_def, ref, atol=1e-1, rtol=1e-1)

    print("KERNEL_OK")
</pallas_src>

<mosaic_0001>
module attributes {stable_mosaic.version = 11 : i64} {
  func.func @re_discriminator_kernel(%arg0: i32, %arg1: memref<128x8xf32, #tpu.memory_space<vmem>>, %arg2: memref<128x8xf32, #tpu.memory_space<vmem>>, %arg3: memref<128x128xf32, #tpu.memory_space<vmem>>, %arg4: memref<1x128xf32, #tpu.memory_space<vmem>>, %arg5: memref<128x128xf32, #tpu.memory_space<vmem>>, %arg6: memref<1x128xf32, #tpu.memory_space<vmem>>, %arg7: memref<128x128xf32, #tpu.memory_space<vmem>>, %arg8: memref<1x128xf32, #tpu.memory_space<vmem>>, %arg9: memref<128x128xf32, #tpu.memory_space<vmem>>, %arg10: memref<1x128xf32, #tpu.memory_space<vmem>>, %arg11: memref<128x128xf32, #tpu.memory_space<vmem>>, %arg12: memref<1x128xf32, #tpu.memory_space<vmem>>, %arg13: memref<1x128xf32, #tpu.memory_space<vmem>>, %arg14: memref<1x1xf32, #tpu.memory_space<smem>>, %arg15: memref<1x128xf32, #tpu.memory_space<vmem>>, %arg16: memref<256x128xf32, #tpu.memory_space<vmem>>) attributes {dimension_semantics = [#tpu.dimension_semantics<parallel>], iteration_bounds = array<i64: 2>, scalar_prefetch = 0 : i64, scratch_operands = 1 : i64, tpu.core_type = #tpu.core_type<tc>, window_params = [{transform_indices = @transform_0, window_bounds = array<i64: 128, 8>}, {transform_indices = @transform_1, window_bounds = array<i64: 128, 8>}, {pipeline_mode = #tpu.pipeline_mode<synchronous>, transform_indices = @transform_2, window_bounds = array<i64: 128, 128>}, {pipeline_mode = #tpu.pipeline_mode<synchronous>, transform_indices = @transform_3, window_bounds = array<i64: 1, 128>}, {pipeline_mode = #tpu.pipeline_mode<synchronous>, transform_indices = @transform_4, window_bounds = array<i64: 128, 128>}, {pipeline_mode = #tpu.pipeline_mode<synchronous>, transform_indices = @transform_5, window_bounds = array<i64: 1, 128>}, {pipeline_mode = #tpu.pipeline_mode<synchronous>, transform_indices = @transform_6, window_bounds = array<i64: 128, 128>}, {pipeline_mode = #tpu.pipeline_mode<synchronous>, transform_indices = @transform_7, window_bounds = array<i64: 1, 128>}, {pipeline_mode = #tpu.pipeline_mode<synchronous>, transform_indices = @transform_8, window_bounds = array<i64: 128, 128>}, {pipeline_mode = #tpu.pipeline_mode<synchronous>, transform_indices = @transform_9, window_bounds = array<i64: 1, 128>}, {pipeline_mode = #tpu.pipeline_mode<synchronous>, transform_indices = @transform_10, window_bounds = array<i64: 128, 128>}, {pipeline_mode = #tpu.pipeline_mode<synchronous>, transform_indices = @transform_11, window_bounds = array<i64: 1, 128>}, {pipeline_mode = #tpu.pipeline_mode<synchronous>, transform_indices = @transform_12, window_bounds = array<i64: 1, 128>}, {transform_indices = @transform_13, window_bounds = array<i64: 1, 1>}, {transform_indices = @transform_14, window_bounds = array<i64: 1, 128>}]} {
    %cst = arith.constant 0.000000e+00 : f32
    %0 = vector.broadcast %cst : f32 to vector<256x128xf32>
    %c0 = arith.constant 0 : index
    %c0_0 = arith.constant 0 : index
    %1 = vector.load %arg16[%c0, %c0_0] : memref<256x128xf32, #tpu.memory_space<vmem>>, vector<256x128xf32>
    tpu.vector_store %arg16[%c0, %c0_0], %0 {strides = array<i32>} : memref<256x128xf32, #tpu.memory_space<vmem>>, vector<256x128xf32>,
    %c0_1 = arith.constant 0 : index
    %c0_2 = arith.constant 0 : index
    %2 = vector.load %arg1[%c0_1, %c0_2] : memref<128x8xf32, #tpu.memory_space<vmem>>, vector<128x8xf32>
    %c0_3 = arith.constant 0 : index
    %c0_4 = arith.constant 0 : index
    %3 = vector.load %arg16[%c0_3, %c0_4] : memref<256x128xf32, #tpu.memory_space<vmem>>, vector<128x8xf32>
    tpu.vector_store %arg16[%c0_3, %c0_4], %2 {strides = array<i32>} : memref<256x128xf32, #tpu.memory_space<vmem>>, vector<128x8xf32>,
    %c0_5 = arith.constant 0 : index
    %c0_6 = arith.constant 0 : index
    %4 = vector.load %arg2[%c0_5, %c0_6] : memref<128x8xf32, #tpu.memory_space<vmem>>, vector<128x8xf32>
    %c128 = arith.constant 128 : index
    %c0_7 = arith.constant 0 : index
    %5 = vector.load %arg16[%c128, %c0_7] : memref<256x128xf32, #tpu.memory_space<vmem>>, vector<128x8xf32>
    tpu.vector_store %arg16[%c128, %c0_7], %4 {strides = array<i32>} : memref<256x128xf32, #tpu.memory_space<vmem>>, vector<128x8xf32>,
    %c0_8 = arith.constant 0 : index
    %c0_9 = arith.constant 0 : index
    %6 = vector.load %arg16[%c0_8, %c0_9] : memref<256x128xf32, #tpu.memory_space<vmem>>, vector<256x128xf32>
    %c0_10 = arith.constant 0 : index
    %c0_11 = arith.constant 0 : index
    %7 = vector.load %arg3[%c0_10, %c0_11] : memref<128x128xf32, #tpu.memory_space<vmem>>, vector<128x128xf32>
    %cst_12 = arith.constant dense<0.000000e+00> : vector<256x128xf32>
    %8 = tpu.matmul %6, %7, %cst_12 {dimension_numbers = #tpu.dot_dimension_numbers<[1], [0], [0], [1], [0, 0, 1, 1], [], []>} : vector<256x128xf32>, vector<128x128xf32>, vector<256x128xf32> -> vector<256x128xf32>
    %c0_13 = arith.constant 0 : index
    %c0_14 = arith.constant 0 : index
    %9 = vector.load %arg4[%c0_13, %c0_14] : memref<1x128xf32, #tpu.memory_space<vmem>>, vector<1x128xf32>
    %10 = vector.broadcast %9 : vector<1x128xf32> to vector<256x128xf32>
    %11 = arith.addf %8, %10 : vector<256x128xf32>
    %cst_15 = arith.constant 0.000000e+00 : f32
    %12 = vector.broadcast %cst_15 : f32 to vector<256x128xf32>
    %13 = arith.maximumf %11, %12 : vector<256x128xf32>
    %c0_16 = arith.constant 0 : index
    %c0_17 = arith.constant 0 : index
    %14 = vector.load %arg5[%c0_16, %c0_17] : memref<128x128xf32, #tpu.memory_space<vmem>>, vector<128x128xf32>
    %cst_18 = arith.constant dense<0.000000e+00> : vector<256x128xf32>
    %15 = tpu.matmul %13, %14, %cst_18 {dimension_numbers = #tpu.dot_dimension_numbers<[1], [0], [0], [1], [0, 0, 1, 1], [], []>} : vector<256x128xf32>, vector<128x128xf32>, vector<256x128xf32> -> vector<256x128xf32>
    %c0_19 = arith.constant 0 : index
    %c0_20 = arith.constant 0 : index
    %16 = vector.load %arg6[%c0_19, %c0_20] : memref<1x128xf32, #tpu.memory_space<vmem>>, vector<1x128xf32>
    %17 = vector.broadcast %16 : vector<1x128xf32> to vector<256x128xf32>
    %18 = arith.addf %15, %17 : vector<256x128xf32>
    %cst_21 = arith.constant 0.000000e+00 : f32
    %19 = vector.broadcast %cst_21 : f32 to vector<256x128xf32>
    %20 = arith.maximumf %18, %19 : vector<256x128xf32>
    %c0_22 = arith.constant 0 : index
    %c0_23 = arith.constant 0 : index
    %21 = vector.load %arg7[%c0_22, %c0_23] : memref<128x128xf32, #tpu.memory_space<vmem>>, vector<128x128xf32>
    %cst_24 = arith.constant dense<0.000000e+00> : vector<256x128xf32>
    %22 = tpu.matmul %20, %21, %cst_24 {dimension_numbers = #tpu.dot_dimension_numbers<[1], [0], [0], [1], [0, 0, 1, 1], [], []>} : vector<256x128xf32>, vector<128x128xf32>, vector<256x128xf32> -> vector<256x128xf32>
    %c0_25 = arith.constant 0 : index
    %c0_26 = arith.constant 0 : index
    %23 = vector.load %arg8[%c0_25, %c0_26] : memref<1x128xf32, #tpu.memory_space<vmem>>, vector<1x128xf32>
    %24 = vector.broadcast %23 : vector<1x128xf32> to vector<256x128xf32>
    %25 = arith.addf %22, %24 : vector<256x128xf32>
    %cst_27 = arith.constant 0.000000e+00 : f32
    %26 = vector.broadcast %cst_27 : f32 to vector<256x128xf32>
    %27 = arith.maximumf %25, %26 : vector<256x128xf32>
    %c0_28 = arith.constant 0 : index
    %c0_29 = arith.constant 0 : index
    %28 = vector.load %arg9[%c0_28, %c0_29] : memref<128x128xf32, #tpu.memory_space<vmem>>, vector<128x128xf32>
    %cst_30 = arith.constant dense<0.000000e+00> : vector<256x128xf32>
    %29 = tpu.matmul %27, %28, %cst_30 {dimension_numbers = #tpu.dot_dimension_numbers<[1], [0], [0], [1], [0, 0, 1, 1], [], []>} : vector<256x128xf32>, vector<128x128xf32>, vector<256x128xf32> -> vector<256x128xf32>
    %c0_31 = arith.constant 0 : index
    %c0_32 = arith.constant 0 : index
    %30 = vector.load %arg10[%c0_31, %c0_32] : memref<1x128xf32, #tpu.memory_space<vmem>>, vector<1x128xf32>
    %31 = vector.broadcast %30 : vector<1x128xf32> to vector<256x128xf32>
    %32 = arith.addf %29, %31 : vector<256x128xf32>
    %cst_33 = arith.constant 0.000000e+00 : f32
    %33 = vector.broadcast %cst_33 : f32 to vector<256x128xf32>
    %34 = arith.maximumf %32, %33 : vector<256x128xf32>
    %35 = vector.extract_strided_slice %34 {offsets = [0, 0], sizes = [128, 128], strides = [1, 1]} : vector<256x128xf32> to vector<128x128xf32>
    %36 = vector.extract_strided_slice %34 {offsets = [128, 0], sizes = [128, 128], strides = [1, 1]} : vector<256x128xf32> to vector<128x128xf32>
    %37 = arith.addf %35, %36 : vector<128x128xf32>
    %c0_34 = arith.constant 0 : index
    %c0_35 = arith.constant 0 : index
    %38 = vector.load %arg11[%c0_34, %c0_35] : memref<128x128xf32, #tpu.memory_space<vmem>>, vector<128x128xf32>
    %cst_36 = arith.constant dense<0.000000e+00> : vector<128x128xf32>
    %39 = tpu.matmul %37, %38, %cst_36 {dimension_numbers = #tpu.dot_dimension_numbers<[1], [0], [0], [1], [0, 0, 1, 1], [], []>} : vector<128x128xf32>, vector<128x128xf32>, vector<128x128xf32> -> vector<128x128xf32>
    %c0_37 = arith.constant 0 : index
    %c0_38 = arith.constant 0 : index
    %40 = vector.load %arg12[%c0_37, %c0_38] : memref<1x128xf32, #tpu.memory_space<vmem>>, vector<1x128xf32>
    %41 = vector.broadcast %40 : vector<1x128xf32> to vector<128x128xf32>
    %42 = arith.addf %39, %41 : vector<128x128xf32>
    %cst_39 = arith.constant 0.000000e+00 : f32
    %43 = vector.broadcast %cst_39 : f32 to vector<128x128xf32>
    %44 = arith.maximumf %42, %43 : vector<128x128xf32>
    %c0_40 = arith.constant 0 : index
    %c0_41 = arith.constant 0 : index
    %45 = vector.load %arg13[%c0_40, %c0_41] : memref<1x128xf32, #tpu.memory_space<vmem>>, vector<1x128xf32>
    %cst_42 = arith.constant dense<0.000000e+00> : vector<1x128xf32>
    %46 = tpu.matmul %45, %44, %cst_42 {dimension_numbers = #tpu.dot_dimension_numbers<[1], [1], [0], [0], [0, 0, 1, 0], [], []>} : vector<1x128xf32>, vector<128x128xf32>, vector<1x128xf32> -> vector<1x128xf32>
    %c0_43 = arith.constant 0 : index
    %c0_44 = arith.constant 0 : index
    %47 = memref.load %arg14[%c0_43, %c0_44] : memref<1x1xf32, #tpu.memory_space<smem>>
    %48 = vector.broadcast %47 : f32 to vector<1x128xf32>
    %49 = arith.addf %46, %48 : vector<1x128xf32>
    %c0_45 = arith.constant 0 : index
    %c0_46 = arith.constant 0 : index
    %50 = vector.load %arg15[%c0_45, %c0_46] : memref<1x128xf32, #tpu.memory_space<vmem>>, vector<1x128xf32>
    tpu.vector_store %arg15[%c0_45, %c0_46], %49 {strides = array<i32>} : memref<1x128xf32, #tpu.memory_space<vmem>>, vector<1x128xf32>,
    return
  }
  func.func @transform_0(%arg0: i32) -> (i32, i32) {
    %c0_i32 = arith.constant 0 : i32
    %c0_i32_0 = arith.constant 0 : i32
    return %arg0, %c0_i32 : i32, i32
  }
  func.func @transform_1(%arg0: i32) -> (i32, i32) {
    %c0_i32 = arith.constant 0 : i32
    %c0_i32_0 = arith.constant 0 : i32
    return %arg0, %c0_i32 : i32, i32
  }
  func.func @transform_2(%arg0: i32) -> (i32, i32) {
    %c0_i32 = arith.constant 0 : i32
    %c0_i32_0 = arith.constant 0 : i32
    %c0_i32_1 = arith.constant 0 : i32
    return %c0_i32, %c0_i32_0 : i32, i32
  }
  func.func @transform_3(%arg0: i32) -> (i32, i32) {
    %c0_i32 = arith.constant 0 : i32
    %c0_i32_0 = arith.constant 0 : i32
    %c0_i32_1 = arith.constant 0 : i32
    return %c0_i32, %c0_i32_0 : i32, i32
  }
  func.func @transform_4(%arg0: i32) -> (i32, i32) {
    %c0_i32 = arith.constant 0 : i32
    %c0_i32_0 = arith.constant 0 : i32
    %c0_i32_1 = arith.constant 0 : i32
    return %c0_i32, %c0_i32_0 : i32, i32
  }
  func.func @transform_5(%arg0: i32) -> (i32, i32) {
    %c0_i32 = arith.constant 0 : i32
    %c0_i32_0 = arith.constant 0 : i32
    %c0_i32_1 = arith.constant 0 : i32
    return %c0_i32, %c0_i32_0 : i32, i32
  }
  func.func @transform_6(%arg0: i32) -> (i32, i32) {
    %c0_i32 = arith.constant 0 : i32
    %c0_i32_0 = arith.constant 0 : i32
    %c0_i32_1 = arith.constant 0 : i32
    return %c0_i32, %c0_i32_0 : i32, i32
  }
  func.func @transform_7(%arg0: i32) -> (i32, i32) {
    %c0_i32 = arith.constant 0 : i32
    %c0_i32_0 = arith.constant 0 : i32
    %c0_i32_1 = arith.constant 0 : i32
    return %c0_i32, %c0_i32_0 : i32, i32
  }
  func.func @transform_8(%arg0: i32) -> (i32, i32) {
    %c0_i32 = arith.constant 0 : i32
    %c0_i32_0 = arith.constant 0 : i32
    %c0_i32_1 = arith.constant 0 : i32
    return %c0_i32, %c0_i32_0 : i32, i32
  }
  func.func @transform_9(%arg0: i32) -> (i32, i32) {
    %c0_i32 = arith.constant 0 : i32
    %c0_i32_0 = arith.constant 0 : i32
    %c0_i32_1 = arith.constant 0 : i32
    return %c0_i32, %c0_i32_0 : i32, i32
  }
  func.func @transform_10(%arg0: i32) -> (i32, i32) {
    %c0_i32 = arith.constant 0 : i32
    %c0_i32_0 = arith.constant 0 : i32
    %c0_i32_1 = arith.constant 0 : i32
    return %c0_i32, %c0_i32_0 : i32, i32
  }
  func.func @transform_11(%arg0: i32) -> (i32, i32) {
    %c0_i32 = arith.constant 0 : i32
    %c0_i32_0 = arith.constant 0 : i32
    %c0_i32_1 = arith.constant 0 : i32
    return %c0_i32, %c0_i32_0 : i32, i32
  }
  func.func @transform_12(%arg0: i32) -> (i32, i32) {
    %c0_i32 = arith.constant 0 : i32
    %c0_i32_0 = arith.constant 0 : i32
    %c0_i32_1 = arith.constant 0 : i32
    return %c0_i32, %c0_i32_0 : i32, i32
  }
  func.func @transform_13(%arg0: i32) -> (i32, i32) {
    %c0_i32 = arith.constant 0 : i32
    %c0_i32_0 = arith.constant 0 : i32
    %c0_i32_1 = arith.constant 0 : i32
    return %c0_i32, %c0_i32_0 : i32, i32
  }
  func.func @transform_14(%arg0: i32) -> (i32, i32) {
    %c0_i32 = arith.constant 0 : i32
    %c0_i32_0 = arith.constant 0 : i32
    return %c0_i32, %arg0 : i32, i32
  }
}

</mosaic_0001>

<bundles_post_ra>
// kernel: tpu_custom_call.1
= control target key start
LH: loop header
LB: loop body
LE: loop exit
PB: predicated region body
PF: predicated region fallthrough
CT: control target
= control target key end

     0   :  { %s2425_s0 = inlined_call_operand.vmem [shape: f32[256,8], index: 0, kind: input, shape index: {}]   ;;  %s2426_s1 = inlined_call_operand.vmem [shape: f32[256,8], index: 1, kind: input, shape index: {}]   ;;  %s2427_s2 = inlined_call_operand.vmem [shape: f32[128,128], index: 2, kind: input, shape index: {}]   ;;  %s2428_s3 = inlined_call_operand.vmem [shape: f32[1,128], index: 3, kind: input, shape index: {}]   ;;  %s2429_s4 = inlined_call_operand.vmem [shape: f32[128,128], index: 4, kind: input, shape index: {}]   ;;  %s2430_s5 = inlined_call_operand.vmem [shape: f32[1,128], index: 5, kind: input, shape index: {}]   ;;  %s2431_s6 = inlined_call_operand.vmem [shape: f32[128,128], index: 6, kind: input, shape index: {}]   ;;  %s2432_s7 = inlined_call_operand.vmem [shape: f32[1,128], index: 7, kind: input, shape index: {}]   ;;  %s2433_s8 = inlined_call_operand.vmem [shape: f32[128,128], index: 8, kind: input, shape index: {}]   ;;  %s2434_s9 = inlined_call_operand.vmem [shape: f32[1,128], index: 9, kind: input, shape index: {}]   ;;  %s2435_s10 = inlined_call_operand.hbm [shape: f32[128,128], index: 10, kind: input, shape index: {}]   ;;  %s2436_s11 = inlined_call_operand.vmem [shape: f32[1,128], index: 11, kind: input, shape index: {}]   ;;  %s2437_s12 = inlined_call_operand.vmem [shape: f32[1,128], index: 12, kind: input, shape index: {}]   ;;  %s2438_s13 = inlined_call_operand.<no memory space> [shape: f32[1,1], index: 13, kind: input, shape index: {}]   ;;  %s2439_s14 = inlined_call_operand.hbm [shape: f32[1,256], index: 14, kind: output, shape index: {}]  }
   0x1   :  { %2440 = sst [smem:[#allocation11_spill]] %s2425_s0 }
   0x2   :  { %2441 = sst [smem:[#allocation12_spill]] %s2426_s1 }
   0x3   :  { %2442 = sst [smem:[#allocation13_spill]] %s2435_s10 }
   0x4   :  { %19 = sst [smem:[#allocation3]] %s2438_s13 }
   0x5   :  { %20 = vsyncpa [#allocation5], 0 }
   0x6   :  { %21 = vsyncpa [#allocation6], 0 }
   0x7   :  { %23 = vsyncpa [#allocation6 + $0x1], 0  ;;  %s1827_s15 = smov 0   ;;  %s1829_s16 = smov 0  }
   0x8   :  { %s1831_s17 = smov 0   ;;  %s1833_s18 = smov 0  }
   0x9 LB: > { %s1848_s13 = sadd.s32 4294967295, %s1743_s18   ;;  %s1529_s19 = sadd.s32 4294967294, %s1743_s18   ;;  %s1743_s18 = sphi %s1833_s18, %s2453_s18   ;;  %s1739_s17 = sphi %s1831_s17, %s2452_s17   ;;  %s1735_s16 = sphi %s1829_s16, %s2451_s16   ;;  %s1731_s15 = sphi %s1827_s15, %s2450_s15  }
   0xa   : > { %s1852_s20 = sadd.s32 1, %s1743_s18   ;;  %s340_s21 = sadd.s32 1, %s1739_s17 }
   0xb   : > { %s337_s22 = ssub.s32 %s1743_s18, %s1852_s20  ;;  %p350_p0 = scmp.ne.s32.totalorder %s1739_s17, %s1735_s16 }
   0xc   : > { %p338_p1 = scmp.eq.s32.totalorder %s337_s22, 0  ;;  %p351_p2 = scmp.eq.s32.totalorder %s1848_s13, 1 }
   0xd   : > { %p356_p3 = scmp.ne.s32.totalorder %s1735_s16, %s1731_s15  ;;  %p357_p4 = scmp.eq.s32.totalorder %s1529_s19, 1 }
   0xe   : > { %s1863_s23 = scalar_select %p338_p1, %s1739_s17, %s340_s21  }
   0xf   : > { %p1865_p5 = por %p351_p2, %p350_p0  ;;  %p1869_p6 = por %p357_p4, %p356_p3 }
  0x10   : > { %2443 = sst [smem:[#allocation10_spill]] %s1863_s23  ;;  %p1530_p7 = scmp.ge.s32.totalorder %s1743_s18, 1 }
  0x11   : > { %p364_p8 = scmp.lt.s32.totalorder %s1743_s18, 3  ;;  %p1603_p9 = scmp.eq.s32.totalorder %s1848_s13, 0 }
  0x12   : > { %s2446_s10 = sld [smem:[#allocation13_spill]]  ;;  %s1745_s29 = smov [#allocation4]  }
  0x13   : > { %p365_p10 = pnand %p1530_p7, %p364_p8  ;;  %s401_s30 = sshll.u32 %s1745_s29, 4  ;;  %s402_s30 = int_to_ptr.vmem [resolvable:$true] %s401_s30 }
  0x14   : > { %s1746_s19 = smov 128   ;;  %s1747_s21 = smov 8  }
  0x15   : > { %p1595_p11 = pneg %p365_p10  ;;  %444 = sbr.rel (%p365_p10) target bundleno = 1167 (0x48f), region = 76 }
  0x17   : > { %p1596_p12 = pnand %p1603_p9, %p1595_p11 }
  0x18   : > { %s399_s28 = sshll.u32 %s2446_s10, 4  ;;  %s400_s28 = int_to_ptr.hbm [resolvable:$true] %s399_s28 }
  0x19   : > { %1598 = dma.hbm_to_vmem [thread:$0]  (!%p1596_p12), %s400_s28, 2048, %s402_s30, [#allocation5], %s1746_s19, %s1746_s19, %s1747_s21  }
  0x1a   : > { %1722 = dma.done.wait (%p1603_p9), [#allocation5], 2048  }
  0x1b   : > { %1724 = vsyncadd (%p1603_p9), [#allocation5], 4294965248  ;;  %s1535_s22 = sshll.u32 %s1848_s13, 4  ;;  %v1748_v0 = vmov 0.0   ;;  %v651_v1 = vld [vmem:[%s2427_s2 + $0x78] sm:$0xff]  ;;  %v650_v2 = vld [vmem:[%s2427_s2 + $0x70] sm:$0xff] }
  0x1c   : > { %p496_p13 = scmp.lt.s32.totalorder %s1535_s22, 31  ;;  %507 = vst [vmem:[#allocation2] sm:$0xff] %v1748_v0  ;;  %656 = vmatpush.msra.mxu0 %v651_v1  ;;  %1541 = vmatpush.msra.mxu1 %v651_v1  ;;  %v649_v3 = vld [vmem:[%s2427_s2 + $0x68] sm:$0xff]  ;;  %s2447_s0 = sld [smem:[#allocation11_spill]]  ;;  %vm555_vm0 = vcmask 64512   ;;  %v648_v4 = vld [vmem:[%s2427_s2 + $0x60] sm:$0xff] }
  0x1d   : > { %508 = vst [vmem:[#allocation2 + $0x8] sm:$0xff] %v1748_v0  ;;  %1542 = vmatpush.msra.mxu2 %v651_v1  ;;  %1543 = vmatpush.msra.mxu3 %v651_v1  ;;  %v647_v6 = vld [vmem:[%s2427_s2 + $0x58] sm:$0xff]  ;;  %v646_v7 = vld [vmem:[%s2427_s2 + $0x50] sm:$0xff]  ;;  %v645_v8 = vld [vmem:[%s2427_s2 + $0x48] sm:$0xff]  ;;  %s2448_s1 = sld [smem:[#allocation12_spill]]  ;;  %s493_s23 = sand.u32 1, %s1735_s16  }
  0x1e   : > { %s2455_s22 = smov (!%p496_p13, %s1535_s22), 31  ;;  %509 = vst [vmem:[#allocation2 + $0x10] sm:$0xff] %v1748_v0  ;;  %657 = vmatpush.msra.mxu0 %v650_v2  ;;  %1544 = vmatpush.msra.mxu1 %v650_v2  ;;  %v644_v9 = vld [vmem:[%s2427_s2 + $0x40] sm:$0xff]  ;;  %v643_v10 = vld [vmem:[%s2427_s2 + $0x38] sm:$0xff]  ;;  %v642_v11 = vld [vmem:[%s2427_s2 + $0x30] sm:$0xff]  ;;  %s494_s28 = scalar_lea.vmem [#allocation7], %s493_s23 }
  0x1f   : > { %510 = vst [vmem:[#allocation2 + $0x18] sm:$0xff] %v1748_v0  ;;  %s1536_s26 = sshll.u32 %s2455_s22, 3  ;;  %1545 = vmatpush.msra.mxu2 %v650_v2  ;;  %1546 = vmatpush.msra.mxu3 %v650_v2  ;;  %v641_v12 = vld [vmem:[%s2427_s2 + $0x28] sm:$0xff]  ;;  %v640_v13 = vld [vmem:[%s2427_s2 + $0x20] sm:$0xff]  ;;  %v639_v14 = vld [vmem:[%s2427_s2 + $0x18] sm:$0xff]  ;;  %s1448_s29 = sshll.u32 %s494_s28, 4  ;;  %s1449_s29 = int_to_ptr.vmem [resolvable:$true] %s1448_s29 }
  0x20   : > { %511 = vst [vmem:[#allocation2 + $0x20] sm:$0xff] %v1748_v0  ;;  %658 = vmatpush.msra.mxu0 %v649_v3  ;;  %1547 = vmatpush.msra.mxu1 %v649_v3  ;;  %v638_v15 = vld [vmem:[%s2427_s2 + $0x10] sm:$0xff]  ;;  %v637_v18 = vld [vmem:[%s2427_s2 + $0x8] sm:$0xff]  ;;  %v636_v21 = vld [vmem:[%s2427_s2] sm:$0xff] }
  0x21   : > { %512 = vst [vmem:[#allocation2 + $0x28] sm:$0xff] %v1748_v0  ;;  %1548 = vmatpush.msra.mxu2 %v649_v3  ;;  %1549 = vmatpush.msra.mxu3 %v649_v3  ;;  %v816_v40 = vld [vmem:[%s2429_s4 + $0x78] sm:$0xff]  ;;  %v815_v41 = vld [vmem:[%s2429_s4 + $0x70] sm:$0xff]  ;;  %v814_v42 = vld [vmem:[%s2429_s4 + $0x68] sm:$0xff] }
  0x22   : > { %513 = vst [vmem:[#allocation2 + $0x30] sm:$0xff] %v1748_v0  ;;  %s1911_s27 = scalar_lea.vmem %s2447_s0, %s1536_s26  ;;  %659 = vmatpush.msra.mxu0 %v648_v4  ;;  %1550 = vmatpush.msra.mxu1 %v648_v4  ;;  %v813_v45 = vld [vmem:[%s2429_s4 + $0x60] sm:$0xff]  ;;  %v812_v46 = vld [vmem:[%s2429_s4 + $0x58] sm:$0xff]  ;;  %v811_v48 = vld [vmem:[%s2429_s4 + $0x50] sm:$0xff]  ;;  %s1438_s0 = scalar_lea.sflag [#allocation6], %s493_s23 }
  0x23   : > { %514 = vst [vmem:[#allocation2 + $0x38] sm:$0xff] %v1748_v0  ;;  %v539_v5 = vld [vmem:[%s1911_s27] sm:$0xff]  ;;  %1551 = vmatpush.msra.mxu2 %v648_v4  ;;  %1552 = vmatpush.msra.mxu3 %v648_v4  ;;  %v540_v16 = vld [vmem:[%s1911_s27 + $0x8] sm:$0xff]  ;;  %v541_v17 = vld [vmem:[%s1911_s27 + $0x10] sm:$0xff]  ;;  %s2018_s19 = scalar_lea.vmem %s2448_s1, %s1536_s26  ;;  %s1414_s26 = sld [smem:[#allocation3]] }
  0x24   : > { %515 = vst [vmem:[#allocation2 + $0x40] sm:$0xff] %v1748_v0  ;;  %660 = vmatpush.msra.mxu0 %v647_v6  ;;  %1553 = vmatpush.msra.mxu1 %v647_v6  ;;  %v542_v19 = vld [vmem:[%s1911_s27 + $0x18] sm:$0xff]  ;;  %v543_v20 = vld [vmem:[%s1911_s27 + $0x20] sm:$0xff]  ;;  %v544_v23 = vld [vmem:[%s1911_s27 + $0x28] sm:$0xff] }
  0x25   : > { %516 = vst [vmem:[#allocation2 + $0x48] sm:$0xff] %v1748_v0  ;;  %1554 = vmatpush.msra.mxu2 %v647_v6  ;;  %1555 = vmatpush.msra.mxu3 %v647_v6  ;;  %v545_v25 = vld [vmem:[%s1911_s27 + $0x30] sm:$0xff]  ;;  %v546_v27 = vld [vmem:[%s1911_s27 + $0x38] sm:$0xff]  ;;  %v547_v29 = vld [vmem:[%s1911_s27 + $0x40] sm:$0xff] }
  0x26   : > { %517 = vst [vmem:[#allocation2 + $0x50] sm:$0xff] %v1748_v0  ;;  %661 = vmatpush.msra.mxu0 %v646_v7  ;;  %1556 = vmatpush.msra.mxu1 %v646_v7  ;;  %v548_v31 = vld [vmem:[%s1911_s27 + $0x48] sm:$0xff]  ;;  %v549_v33 = vld [vmem:[%s1911_s27 + $0x50] sm:$0xff]  ;;  %v550_v35 = vld [vmem:[%s1911_s27 + $0x58] sm:$0xff] }
  0x27   : > { %518 = vst [vmem:[#allocation2 + $0x58] sm:$0xff] %v1748_v0  ;;  %1557 = vmatpush.msra.mxu2 %v646_v7  ;;  %1558 = vmatpush.msra.mxu3 %v646_v7  ;;  %v551_v37 = vld [vmem:[%s1911_s27 + $0x60] sm:$0xff]  ;;  %v552_v39 = vld [vmem:[%s1911_s27 + $0x68] sm:$0xff]  ;;  %v553_v44 = vld [vmem:[%s1911_s27 + $0x70] sm:$0xff] }
  0x28   : > { %556 = vst.msk [vmem:[#allocation2] sm:$0xff] %vm555_vm0, %v539_v5  ;;  %662 = vmatpush.msra.mxu0 %v645_v8  ;;  %1559 = vmatpush.msra.mxu1 %v645_v8  ;;  %v577_v47 = vld [vmem:[%s2018_s19 + $0x28] sm:$0xff]  ;;  %v554_v51 = vld [vmem:[%s1911_s27 + $0x78] sm:$0xff]  ;;  %v809_v52 = vld [vmem:[%s2429_s4 + $0x40] sm:$0xff] }
  0x29   : > { %519 = vst [vmem:[#allocation2 + $0x60] sm:$0xff] %v1748_v0  ;;  %1560 = vmatpush.msra.mxu2 %v645_v8  ;;  %1561 = vmatpush.msra.mxu3 %v645_v8  ;;  %v810_v49 = vld [vmem:[%s2429_s4 + $0x48] sm:$0xff]  ;;  %v808_v53 = vld [vmem:[%s2429_s4 + $0x38] sm:$0xff]  ;;  %v578_v55 = vld [vmem:[%s2018_s19 + $0x30] sm:$0xff] }
  0x2a   : > { %520 = vst [vmem:[#allocation2 + $0x68] sm:$0xff] %v1748_v0  ;;  %663 = vmatpush.msra.mxu0 %v644_v9  ;;  %1562 = vmatpush.msra.mxu1 %v644_v9  ;;  %v807_v56 = vld [vmem:[%s2429_s4 + $0x30] sm:$0xff]  ;;  %v806_v57 = vld [vmem:[%s2429_s4 + $0x28] sm:$0xff]  ;;  %v572_v59 = vld [vmem:[%s2018_s19] sm:$0xff] }
  0x2b   : > { %521 = vst [vmem:[#allocation2 + $0x70] sm:$0xff] %v1748_v0  ;;  %1563 = vmatpush.msra.mxu2 %v644_v9  ;;  %1564 = vmatpush.msra.mxu3 %v644_v9  ;;  %v805_v60 = vld [vmem:[%s2429_s4 + $0x20] sm:$0xff]  ;;  %v804_v61 = vld [vmem:[%s2429_s4 + $0x18] sm:$0xff]  ;;  %v803_v63 = vld [vmem:[%s2429_s4 + $0x10] sm:$0xff] }
  0x2c   : > { %522 = vst [vmem:[#allocation2 + $0x78] sm:$0xff] %v1748_v0  ;;  %664 = vmatpush.msra.mxu0 %v643_v10  ;;  %1565 = vmatpush.msra.mxu1 %v643_v10  ;;  %v802_v1 = vld [vmem:[%s2429_s4 + $0x8] sm:$0xff]  ;;  %v801_v3 = vld [vmem:[%s2429_s4] sm:$0xff]  ;;  %v574_v5 = vld [vmem:[%s2018_s19 + $0x10] sm:$0xff] }
  0x2d   : > { %523 = vst [vmem:[#allocation2 + $0x80] sm:$0xff] %v1748_v0  ;;  %1566 = vmatpush.msra.mxu2 %v643_v10  ;;  %1567 = vmatpush.msra.mxu3 %v643_v10  ;;  %v573_v2 = vld [vmem:[%s2018_s19 + $0x8] sm:$0xff]  ;;  %v575_v7 = vld [vmem:[%s2018_s19 + $0x18] sm:$0xff]  ;;  %v576_v9 = vld [vmem:[%s2018_s19 + $0x20] sm:$0xff] }
  0x2e   : > { %524 = vst [vmem:[#allocation2 + $0x88] sm:$0xff] %v1748_v0  ;;  %665 = vmatpush.msra.mxu0 %v642_v11  ;;  %1568 = vmatpush.msra.mxu1 %v642_v11  ;;  %v2080_v10 = vld [vmem:[%s2428_s3] ss:$0 sm:$0xff] }
  0x2f   : > { %525 = vst [vmem:[#allocation2 + $0x90] sm:$0xff] %v1748_v0  ;;  %1569 = vmatpush.msra.mxu2 %v642_v11  ;;  %1570 = vmatpush.msra.mxu3 %v642_v11  ;;  %v604_v22 = vld [vmem:[#allocation2] sm:$0xff] }
  0x30   : > { %526 = vst [vmem:[#allocation2 + $0x98] sm:$0xff] %v1748_v0  ;;  %666 = vmatpush.msra.mxu0 %v641_v12  ;;  %1571 = vmatpush.msra.mxu1 %v641_v12 }
  0x31   : > { %527 = vst [vmem:[#allocation2 + $0xa0] sm:$0xff] %v1748_v0  ;;  %1572 = vmatpush.msra.mxu2 %v641_v12  ;;  %1573 = vmatpush.msra.mxu3 %v641_v12 }
  0x32   : > { %528 = vst [vmem:[#allocation2 + $0xa8] sm:$0xff] %v1748_v0  ;;  %667 = vmatpush.msra.mxu0 %v640_v13  ;;  %1574 = vmatpush.msra.mxu1 %v640_v13 }
  0x33   : > { %529 = vst [vmem:[#allocation2 + $0xb0] sm:$0xff] %v1748_v0  ;;  %1575 = vmatpush.msra.mxu2 %v640_v13  ;;  %1576 = vmatpush.msra.mxu3 %v640_v13 }
  0x34   : > { %530 = vst [vmem:[#allocation2 + $0xb8] sm:$0xff] %v1748_v0  ;;  %668 = vmatpush.msra.mxu0 %v639_v14  ;;  %1577 = vmatpush.msra.mxu1 %v639_v14 }
  0x35   : > { %531 = vst [vmem:[#allocation2 + $0xc0] sm:$0xff] %v1748_v0  ;;  %1578 = vmatpush.msra.mxu2 %v639_v14  ;;  %1579 = vmatpush.msra.mxu3 %v639_v14 }
  0x36   : > { %532 = vst [vmem:[#allocation2 + $0xc8] sm:$0xff] %v1748_v0  ;;  %669 = vmatpush.msra.mxu0 %v638_v15  ;;  %1580 = vmatpush.msra.mxu1 %v638_v15 }
  0x37   : > { %533 = vst [vmem:[#allocation2 + $0xd0] sm:$0xff] %v1748_v0  ;;  %1581 = vmatpush.msra.mxu2 %v638_v15  ;;  %1582 = vmatpush.msra.mxu3 %v638_v15 }
  0x38   : > { %534 = vst [vmem:[#allocation2 + $0xd8] sm:$0xff] %v1748_v0  ;;  %670 = vmatpush.msra.mxu0 %v637_v18  ;;  %1583 = vmatpush.msra.mxu1 %v637_v18 }
  0x39   : > { %535 = vst [vmem:[#allocation2 + $0xe0] sm:$0xff] %v1748_v0  ;;  %1584 = vmatpush.msra.mxu2 %v637_v18  ;;  %1585 = vmatpush.msra.mxu3 %v637_v18 }
  0x3a   : > { %536 = vst [vmem:[#allocation2 + $0xe8] sm:$0xff] %v1748_v0  ;;  %671 = vmatpush.msra.mxu0 %v636_v21  ;;  %1586 = vmatpush.msra.mxu1 %v636_v21 }
  0x3b   : > { %537 = vst [vmem:[#allocation2 + $0xf0] sm:$0xff] %v1748_v0  ;;  %672 = vmatmul.f32.vlgmr.msra.gmra.mxu0 %v604_v22  ;;  %1587 = vmatpush.msra.mxu2 %v636_v21 }
  0x3c   : > { %538 = vst [vmem:[#allocation2 + $0xf8] sm:$0xff] %v1748_v0  ;;  %1588 = vmatpush.msra.mxu3 %v636_v21  ;;  %821 = vmatpush.msrb.mxu1 %v816_v40 }
  0x3d   : > { %557 = vst.msk [vmem:[#allocation2 + $0x8] sm:$0xff] %vm555_vm0, %v540_v16 }
  0x3e   : > { %558 = vst.msk [vmem:[#allocation2 + $0x10] sm:$0xff] %vm555_vm0, %v541_v17  ;;  %822 = vmatpush.msrb.mxu1 %v815_v41 }
  0x3f   : > { %559 = vst.msk [vmem:[#allocation2 + $0x18] sm:$0xff] %vm555_vm0, %v542_v19  ;;  %v579_v19 = vld [vmem:[%s2018_s19 + $0x38] sm:$0xff] }
  0x40   : > { %560 = vst.msk [vmem:[#allocation2 + $0x20] sm:$0xff] %vm555_vm0, %v543_v20  ;;  %823 = vmatpush.msrb.mxu1 %v814_v42  ;;  %v583_v42 = vld [vmem:[%s2018_s19 + $0x58] sm:$0xff] }
  0x41   : > { %561 = vst.msk [vmem:[#allocation2 + $0x28] sm:$0xff] %vm555_vm0, %v544_v23 }
  0x42   : > { %562 = vst.msk [vmem:[#allocation2 + $0x30] sm:$0xff] %vm555_vm0, %v545_v25  ;;  %824 = vmatpush.msrb.mxu1 %v813_v45  ;;  %v580_v25 = vld [vmem:[%s2018_s19 + $0x40] sm:$0xff] }
  0x43   : > { %563 = vst.msk [vmem:[#allocation2 + $0x38] sm:$0xff] %vm555_vm0, %v546_v27 }
  0x44   : > { %v605_v24 = vld [vmem:[#allocation2 + $0x8] sm:$0xff]  ;;  %564 = vst.msk [vmem:[#allocation2 + $0x40] sm:$0xff] %vm555_vm0, %v547_v29  ;;  %825 = vmatpush.msrb.mxu1 %v812_v46 }
  0x45   : > { %675 = vmatmul.f32.gmra.mxu0 %v605_v24  ;;  %v606_v26 = vld [vmem:[#allocation2 + $0x10] sm:$0xff]  ;;  %565 = vst.msk [vmem:[#allocation2 + $0x48] sm:$0xff] %vm555_vm0, %v548_v31  ;;  %v581_v31 = vld [vmem:[%s2018_s19 + $0x48] sm:$0xff] }
  0x46   : > { %v607_v28 = vld [vmem:[#allocation2 + $0x18] sm:$0xff]  ;;  %566 = vst.msk [vmem:[#allocation2 + $0x50] sm:$0xff] %vm555_vm0, %v549_v33  ;;  %826 = vmatpush.msrb.mxu1 %v811_v48 }
  0x47   : > { %v608_v30 = vld [vmem:[#allocation2 + $0x20] sm:$0xff]  ;;  %567 = vst.msk [vmem:[#allocation2 + $0x58] sm:$0xff] %vm555_vm0, %v550_v35 }
  0x48   : > { %v609_v32 = vld [vmem:[#allocation2 + $0x28] sm:$0xff]  ;;  %568 = vst.msk [vmem:[#allocation2 + $0x60] sm:$0xff] %vm555_vm0, %v551_v37  ;;  %827 = vmatpush.msrb.mxu1 %v810_v49  ;;  %v582_v37 = vld [vmem:[%s2018_s19 + $0x50] sm:$0xff] }
  0x49   : > { %v610_v34 = vld [vmem:[#allocation2 + $0x30] sm:$0xff]  ;;  %569 = vst.msk [vmem:[#allocation2 + $0x68] sm:$0xff] %vm555_vm0, %v552_v39 }
  0x4a   : > { %v611_v36 = vld [vmem:[#allocation2 + $0x38] sm:$0xff]  ;;  %570 = vst.msk [vmem:[#allocation2 + $0x70] sm:$0xff] %vm555_vm0, %v553_v44  ;;  %828 = vmatpush.msrb.mxu1 %v809_v52  ;;  %v585_v52 = vld [vmem:[%s2018_s19 + $0x68] sm:$0xff] }
  0x4b   : > { %v612_v38 = vld [vmem:[#allocation2 + $0x40] sm:$0xff]  ;;  %593 = vst.msk [vmem:[#allocation2 + $0xa8] sm:$0xff] %vm555_vm0, %v577_v47 }
  0x4c   : > { %v613_v43 = vld [vmem:[#allocation2 + $0x48] sm:$0xff]  ;;  %571 = vst.msk [vmem:[#allocation2 + $0x78] sm:$0xff] %vm555_vm0, %v554_v51  ;;  %829 = vmatpush.msrb.mxu1 %v808_v53  ;;  %v584_v47 = vld [vmem:[%s2018_s19 + $0x60] sm:$0xff] }
  0x4d   : > { %678 = vmatmul.f32.gmra.mxu0 %v606_v26  ;;  %v614_v50 = vld [vmem:[#allocation2 + $0x50] sm:$0xff]  ;;  %594 = vst.msk [vmem:[#allocation2 + $0xb0] sm:$0xff] %vm555_vm0, %v578_v55 }
  0x4e   : > { %v615_v58 = vld [vmem:[#allocation2 + $0x58] sm:$0xff]  ;;  %830 = vmatpush.msrb.mxu1 %v807_v56  ;;  %588 = vst.msk [vmem:[#allocation2 + $0x80] sm:$0xff] %vm555_vm0, %v572_v59 }
  0x4f   : > { %v616_v0 = vld [vmem:[#allocation2 + $0x60] sm:$0xff]  ;;  %589 = vst.msk [vmem:[#allocation2 + $0x88] sm:$0xff] %vm555_vm0, %v573_v2 }
  0x50   : > { %831 = vmatpush.msrb.mxu1 %v806_v57  ;;  %v617_v4 = vld [vmem:[#allocation2 + $0x68] sm:$0xff]  ;;  %590 = vst.msk [vmem:[#allocation2 + $0x90] sm:$0xff] %vm555_vm0, %v574_v5  ;;  %v586_v57 = vld [vmem:[%s2018_s19 + $0x70] sm:$0xff]  ;;  %v978_v2 = vld [vmem:[%s2431_s6 + $0x60] sm:$0xff] }
  0x51   : > { %v618_v6 = vld [vmem:[#allocation2 + $0x70] sm:$0xff]  ;;  %591 = vst.msk [vmem:[#allocation2 + $0x98] sm:$0xff] %vm555_vm0, %v575_v7 }
  0x52   : > { %v625_v54 = vld [vmem:[#allocation2 + $0xa8] sm:$0xff]  ;;  %832 = vmatpush.msrb.mxu1 %v805_v60  ;;  %592 = vst.msk [vmem:[#allocation2 + $0xa0] sm:$0xff] %vm555_vm0, %v576_v9 }
  0x53   : > { %735 = vmatmul.f32.vlgmr.msra.gmra.mxu1 %v625_v54  ;;  %v619_v8 = vld [vmem:[#allocation2 + $0x78] sm:$0xff]  ;;  %595 = vst.msk [vmem:[#allocation2 + $0xb8] sm:$0xff] %vm555_vm0, %v579_v19 }
  0x54   : > { %v626_v62 = vld [vmem:[#allocation2 + $0xb0] sm:$0xff]  ;;  %833 = vmatpush.msrb.mxu1 %v804_v61  ;;  %596 = vst.msk [vmem:[#allocation2 + $0xc0] sm:$0xff] %vm555_vm0, %v580_v25  ;;  %v969_v19 = vld [vmem:[%s2431_s6 + $0x18] sm:$0xff]  ;;  %v966_v25 = vld [vmem:[%s2431_s6] sm:$0xff] }
  0x55   : > { %681 = vmatmul.f32.gmra.mxu0 %v607_v28  ;;  %v620_v12 = vld [vmem:[#allocation2 + $0x80] sm:$0xff]  ;;  %597 = vst.msk [vmem:[#allocation2 + $0xc8] sm:$0xff] %vm555_vm0, %v581_v31  ;;  %v980_v61 = vld [vmem:[%s2431_s6 + $0x70] sm:$0xff] }
  0x56   : > { %834 = vmatpush.msrb.mxu1 %v803_v63  ;;  %v621_v16 = vld [vmem:[#allocation2 + $0x88] sm:$0xff]  ;;  %598 = vst.msk [vmem:[#allocation2 + $0xd0] sm:$0xff] %vm555_vm0, %v582_v37  ;;  %v2167_v37 = vld [vmem:[%s2430_s5] ss:$0 sm:$0xff] }
  0x57   : > { %v622_v21 = vld [vmem:[#allocation2 + $0x90] sm:$0xff]  ;;  %599 = vst.msk [vmem:[#allocation2 + $0xd8] sm:$0xff] %vm555_vm0, %v583_v42  ;;  %v979_v63 = vld [vmem:[%s2431_s6 + $0x68] sm:$0xff] }
  0x58   : > { %835 = vmatpush.msrb.mxu1 %v802_v1  ;;  %v623_v27 = vld [vmem:[#allocation2 + $0x98] sm:$0xff]  ;;  %600 = vst.msk [vmem:[#allocation2 + $0xe0] sm:$0xff] %vm555_vm0, %v584_v47 }
  0x59   : > { %v624_v33 = vld [vmem:[#allocation2 + $0xa0] sm:$0xff]  ;;  %601 = vst.msk [vmem:[#allocation2 + $0xe8] sm:$0xff] %vm555_vm0, %v585_v52  ;;  %v587_v1 = vld [vmem:[%s2018_s19 + $0x78] sm:$0xff]  ;;  %s1446_s19 = scalar_lea.hbm %s2439_s14, %s1848_s13  ;;  %s1697_s13 = scalar_lea.hbm %s2439_s14, 2 }
  0x5a   : > { %836 = vmatpush.msrb.mxu1 %v801_v3  ;;  %v627_v24 = vld [vmem:[#allocation2 + $0xb8] sm:$0xff]  ;;  %602 = vst.msk [vmem:[#allocation2 + $0xf0] sm:$0xff] %vm555_vm0, %v586_v57  ;;  %s1450_s10 = sshll.u32 %s1446_s19, 4  ;;  %s1451_s10 = int_to_ptr.hbm [resolvable:$true] %s1450_s10 }
  0x5b   : > { %738 = vmatmul.f32.gmra.mxu1 %v626_v62  ;;  %741 = vmatmul.f32.vlgmr.msra.gmra.mxu2 %v627_v24  ;;  %603 = vst.msk [vmem:[#allocation2 + $0xf8] sm:$0xff] %vm555_vm0, %v587_v1  ;;  %v977_v3 = vld [vmem:[%s2431_s6 + $0x58] sm:$0xff]  ;;  %v967_v24 = vld [vmem:[%s2431_s6 + $0x8] sm:$0xff]  ;;  %s1691_s27 = sshra.s32 %s1451_s10, 4  ;;  %s1692_s27 = int_to_ptr.hbm [resolvable:$true] %s1691_s27 }
  0x5c   : > { %s1693_s22 = scalar_lea.hbm %s1692_s27, 1  ;;  %p1698_p3 = scmp.lt.s32.totalorder %s1692_s27, %s2439_s14 }
  0x5d   : > { %684 = vmatmul.f32.gmra.mxu0 %v608_v30  ;;  %v628_v30 = vld [vmem:[#allocation2 + $0xc0] sm:$0xff]  ;;  %v630_v41 = vld [vmem:[#allocation2 + $0xd0] sm:$0xff]  ;;  %p1694_p0 = scmp.ne.s32.totalorder %s1692_s27, %s1693_s22  ;;  %p1699_p4 = scmp.lt.s32.totalorder %s1697_s13, %s1693_s22 }
  0x5e   : > { %v631_v46 = vld [vmem:[#allocation2 + $0xd8] sm:$0xff] }
  0x5f   : > { %v632_v51 = vld [vmem:[#allocation2 + $0xe0] sm:$0xff]  ;;  %p1695_p1 = pnand %p1694_p0, %p1865_p5  ;;  %p1700_p7 = por %p1699_p4, %p1698_p3 }
  0x60   : > { %756 = vmatmul.f32.vlgmr.msra.gmra.mxu3 %v632_v51  ;;  %v633_v56 = vld [vmem:[#allocation2 + $0xe8] sm:$0xff] }
  0x61   : > { %p1696_p2 = pneg %p1695_p1 }
  0x62   : > { %v635_v9 = vld [vmem:[#allocation2 + $0xf8] sm:$0xff] }
  0x63   : > { %744 = vmatmul.f32.gmra.mxu2 %v628_v30  ;;  %p1701_p8 = pnand %p1700_p7, %p1696_p2 }
  0x65   : > { %687 = vmatmul.f32.gmra.mxu0 %v609_v32 }
  0x68   : > { %759 = vmatmul.f32.gmra.mxu3 %v633_v56 }
  0x6d   : > { %690 = vmatmul.f32.gmra.mxu0 %v610_v34 }
  0x75   : > { %693 = vmatmul.f32.gmra.mxu0 %v611_v36  ;;  %v629_v36 = vld [vmem:[#allocation2 + $0xc8] sm:$0xff] }
  0x76   : > { %747 = vmatmul.f32.gmra.mxu2 %v629_v36 }
  0x7d   : > { %696 = vmatmul.f32.gmra.mxu0 %v612_v38 }
  0x7e   : > { %750 = vmatmul.f32.gmra.mxu2 %v630_v41 }
  0x85   : > { %699 = vmatmul.f32.gmra.mxu0 %v613_v43 }
  0x86   : > { %753 = vmatmul.f32.gmra.mxu2 %v631_v46 }
  0x8d   : > { %702 = vmatmul.f32.gmra.mxu0 %v614_v50 }
  0x95   : > { %705 = vmatmul.f32.gmra.mxu0 %v615_v58  ;;  %v981_v58 = vld [vmem:[%s2431_s6 + $0x78] sm:$0xff] }
  0x96   : > { %986 = vmatpush.msrb.mxu2 %v981_v58 }
  0x98   : > { %987 = vmatpush.msrb.mxu2 %v980_v61 }
  0x9a   : > { %988 = vmatpush.msrb.mxu2 %v979_v63 }
  0x9c   : > { %989 = vmatpush.msrb.mxu2 %v978_v2 }
  0x9d   : > { %708 = vmatmul.f32.gmra.mxu0 %v616_v0  ;;  %v634_v0 = vld [vmem:[#allocation2 + $0xf0] sm:$0xff] }
  0x9e   : > { %762 = vmatmul.f32.gmra.mxu3 %v634_v0  ;;  %990 = vmatpush.msrb.mxu2 %v977_v3 }
  0xa5   : > { %711 = vmatmul.f32.gmra.mxu0 %v617_v4 }
  0xa6   : > { %765 = vmatmul.f32.gmra.mxu3 %v635_v9 }
  0xad   : > { %714 = vmatmul.f32.gmra.mxu0 %v618_v6  ;;  %v976_v6 = vld [vmem:[%s2431_s6 + $0x50] sm:$0xff] }
  0xae   : > { %991 = vmatpush.msrb.mxu2 %v976_v6 }
  0xb5   : > { %717 = vmatmul.f32.gmra.mxu0 %v619_v8  ;;  %v975_v8 = vld [vmem:[%s2431_s6 + $0x48] sm:$0xff] }
  0xb6   : > { %992 = vmatpush.msrb.mxu2 %v975_v8 }
  0xb8   : > { %v673_v11 = vpop.f32.mrf.mxu0 }
  0xb9   : > { %v674_v13 = vadd.f32 %v2080_v10, %v673_v11  ;;  %v974_v11 = vld [vmem:[%s2431_s6 + $0x40] sm:$0xff] }
  0xba   : > { %993 = vmatpush.msrb.mxu2 %v974_v11 }
  0xbb   : > { %v769_v14 = vmax.f32 %v674_v13, 0.0 }
  0xbd   : > { %720 = vmatmul.f32.gmra.mxu0 %v620_v12  ;;  %837 = vmatmul.f32.vlgmr.msrb.gmra.mxu1 %v769_v14  ;;  %v973_v12 = vld [vmem:[%s2431_s6 + $0x38] sm:$0xff] }
  0xbe   : > { %994 = vmatpush.msrb.mxu2 %v973_v12 }
  0xc2   : > { %v676_v15 = vpop.f32.mrf.mxu0 }
  0xc3   : > { %v677_v17 = vadd.f32 %v2080_v10, %v676_v15  ;;  %v972_v15 = vld [vmem:[%s2431_s6 + $0x30] sm:$0xff] }
  0xc4   : > { %995 = vmatpush.msrb.mxu2 %v972_v15 }
  0xc5   : > { %723 = vmatmul.f32.gmra.mxu0 %v621_v16  ;;  %v770_v18 = vmax.f32 %v677_v17, 0.0  ;;  %v971_v17 = vld [vmem:[%s2431_s6 + $0x28] sm:$0xff] }
  0xc6   : > { %996 = vmatpush.msrb.mxu2 %v971_v17 }
  0xc7   : > { %840 = vmatmul.f32.gmra.mxu1 %v770_v18  ;;  %v970_v18 = vld [vmem:[%s2431_s6 + $0x20] sm:$0xff] }
  0xc8   : > { %997 = vmatpush.msrb.mxu2 %v970_v18 }
  0xca   : > { %v679_v20 = vpop.f32.mrf.mxu0  ;;  %998 = vmatpush.msrb.mxu2 %v969_v19 }
  0xcb   : > { %v680_v22 = vadd.f32 %v2080_v10, %v679_v20 }
  0xcd   : > { %726 = vmatmul.f32.gmra.mxu0 %v622_v21  ;;  %v771_v23 = vmax.f32 %v680_v22, 0.0  ;;  %v968_v22 = vld [vmem:[%s2431_s6 + $0x10] sm:$0xff] }
  0xce   : > { %999 = vmatpush.msrb.mxu2 %v968_v22 }
  0xcf   : > { %843 = vmatmul.f32.gmra.mxu1 %v771_v23 }
  0xd0   : > { %1000 = vmatpush.msrb.mxu2 %v967_v24 }
  0xd2   : > { %v682_v26 = vpop.f32.mrf.mxu0  ;;  %1001 = vmatpush.msrb.mxu2 %v966_v25 }
  0xd3   : > { %v683_v28 = vadd.f32 %v2080_v10, %v682_v26 }
  0xd5   : > { %729 = vmatmul.f32.gmra.mxu0 %v623_v27  ;;  %v772_v29 = vmax.f32 %v683_v28, 0.0 }
  0xd7   : > { %846 = vmatmul.f32.gmra.mxu1 %v772_v29  ;;  %v736_v29 = vpop.f32.mrf.mxu1 }
  0xda   : > { %v685_v32 = vpop.f32.mrf.mxu0 }
  0xdb   : > { %v686_v34 = vadd.f32 %v2080_v10, %v685_v32 }
  0xdd   : > { %732 = vmatmul.f32.gmra.mxu0 %v624_v33  ;;  %v773_v35 = vmax.f32 %v686_v34, 0.0 }
  0xde   : > { %v742_v6 = vpop.f32.mrf.mxu2 }
  0xdf   : > { %849 = vmatmul.f32.gmra.mxu1 %v773_v35  ;;  %v739_v34 = vpop.f32.mrf.mxu1  ;;  %v743_v17 = vadd.f32 %v2080_v10, %v742_v6 }
  0xe0   : > { %v740_v11 = vadd.f32 %v2080_v10, %v739_v34 }
  0xe1   : > { %v792_v18 = vmax.f32 %v743_v17, 0.0 }
  0xe2   : > { %v688_v38 = vpop.f32.mrf.mxu0 }
  0xe3   : > { %v689_v39 = vadd.f32 %v2080_v10, %v688_v38 }
  0xe5   : > { %v774_v40 = vmax.f32 %v689_v39, 0.0 }
  0xe6   : > { %v745_v15 = vpop.f32.mrf.mxu2 }
  0xe7   : > { %852 = vmatmul.f32.gmra.mxu1 %v774_v40  ;;  %v746_v22 = vadd.f32 %v2080_v10, %v745_v15 }
  0xe9   : > { %v793_v24 = vmax.f32 %v746_v22, 0.0 }
  0xea   : > { %v691_v43 = vpop.f32.mrf.mxu0 }
  0xeb   : > { %v692_v44 = vadd.f32 %v2080_v10, %v691_v43 }
  0xed   : > { %v775_v45 = vmax.f32 %v692_v44, 0.0 }
  0xef   : > { %855 = vmatmul.f32.gmra.mxu1 %v775_v45 }
  0xf2   : > { %v694_v48 = vpop.f32.mrf.mxu0 }
  0xf3   : > { %v695_v49 = vadd.f32 %v2080_v10, %v694_v48 }
  0xf5   : > { %v776_v50 = vmax.f32 %v695_v49, 0.0 }
  0xf7   : > { %858 = vmatmul.f32.gmra.mxu1 %v776_v50 }
  0xfa   : > { %v697_v53 = vpop.f32.mrf.mxu0 }
  0xfb   : > { %v698_v54 = vadd.f32 %v2080_v10, %v697_v53 }
  0xfd   : > { %v777_v55 = vmax.f32 %v698_v54, 0.0 }
  0xff   : > { %861 = vmatmul.f32.gmra.mxu1 %v777_v55 }
 0x102   : > { %v700_v59 = vpop.f32.mrf.mxu0 }
 0x103   : > { %v701_v60 = vadd.f32 %v2080_v10, %v700_v59 }
 0x105   : > { %v778_v62 = vmax.f32 %v701_v60, 0.0 }
 0x107   : > { %864 = vmatmul.f32.gmra.mxu1 %v778_v62 }
 0x10a   : > { %v703_v4 = vpop.f32.mrf.mxu0 }
 0x10b   : > { %v704_v5 = vadd.f32 %v2080_v10, %v703_v4  ;;  %v737_v4 = vadd.f32 %v2080_v10, %v736_v29 }
 0x10d   : > { %v779_v7 = vmax.f32 %v704_v5, 0.0  ;;  %v790_v8 = vmax.f32 %v737_v4, 0.0 }
 0x10f   : > { %867 = vmatmul.f32.gmra.mxu1 %v779_v7 }
 0x112   : > { %v706_v13 = vpop.f32.mrf.mxu0 }
 0x113   : > { %v707_v14 = vadd.f32 %v2080_v10, %v706_v13  ;;  %v791_v13 = vmax.f32 %v740_v11, 0.0 }
 0x115   : > { %v780_v16 = vmax.f32 %v707_v14, 0.0 }
 0x117   : > { %870 = vmatmul.f32.gmra.mxu1 %v780_v16 }
 0x11a   : > { %v709_v20 = vpop.f32.mrf.mxu0 }
 0x11b   : > { %v710_v21 = vadd.f32 %v2080_v10, %v709_v20 }
 0x11d   : > { %v781_v23 = vmax.f32 %v710_v21, 0.0 }
 0x11f   : > { %873 = vmatmul.f32.gmra.mxu1 %v781_v23  ;;  %v748_v23 = vpop.f32.mrf.mxu2 }
 0x122   : > { %v712_v26 = vpop.f32.mrf.mxu0 }
 0x123   : > { %v713_v27 = vadd.f32 %v2080_v10, %v712_v26 }
 0x125   : > { %v782_v28 = vmax.f32 %v713_v27, 0.0 }
 0x127   : > { %876 = vmatmul.f32.gmra.mxu1 %v782_v28  ;;  %v749_v28 = vadd.f32 %v2080_v10, %v748_v23  ;;  %v751_v29 = vpop.f32.mrf.mxu2 }
 0x128   : > { %v752_v34 = vadd.f32 %v2080_v10, %v751_v29 }
 0x12a   : > { %v715_v30 = vpop.f32.mrf.mxu0 }
 0x12b   : > { %v716_v31 = vadd.f32 %v2080_v10, %v715_v30  ;;  %v794_v30 = vmax.f32 %v749_v28, 0.0 }
 0x12d   : > { %v783_v32 = vmax.f32 %v716_v31, 0.0 }
 0x12f   : > { %879 = vmatmul.f32.gmra.mxu1 %v783_v32 }
 0x132   : > { %v718_v33 = vpop.f32.mrf.mxu0 }
 0x133   : > { %v719_v35 = vadd.f32 %v2080_v10, %v718_v33 }
 0x135   : > { %v784_v36 = vmax.f32 %v719_v35, 0.0  ;;  %v1146_v35 = vld [vmem:[%s2433_s8 + $0x78] sm:$0xff] }
 0x136   : > { %1151 = vmatpush.msrb.mxu3 %v1146_v35 }
 0x137   : > { %882 = vmatmul.f32.gmra.mxu1 %v784_v36  ;;  %v795_v36 = vmax.f32 %v752_v34, 0.0 }
 0x13a   : > { %v721_v38 = vpop.f32.mrf.mxu0  ;;  %v838_v40 = vpop.f32.mrf.mxu1 }
 0x13b   : > { %v722_v39 = vadd.f32 %v2080_v10, %v721_v38  ;;  %v839_v42 = vadd.f32 %v2167_v37, %v838_v40  ;;  %v1145_v38 = vld [vmem:[%s2433_s8 + $0x70] sm:$0xff]  ;;  %v754_v40 = vpop.f32.mrf.mxu2 }
 0x13c   : > { %1152 = vmatpush.msrb.mxu3 %v1145_v38 }
 0x13d   : > { %v785_v41 = vmax.f32 %v722_v39, 0.0  ;;  %v934_v43 = vmax.f32 %v839_v42, 0.0  ;;  %v1144_v42 = vld [vmem:[%s2433_s8 + $0x68] sm:$0xff] }
 0x13e   : > { %1153 = vmatpush.msrb.mxu3 %v1144_v42 }
 0x13f   : > { %885 = vmatmul.f32.gmra.mxu1 %v785_v41  ;;  %1002 = vmatmul.f32.vlgmr.msrb.gmra.mxu2 %v934_v43  ;;  %v757_v43 = vpop.f32.mrf.mxu3 }
 0x142   : > { %v724_v44 = vpop.f32.mrf.mxu0 }
 0x143   : > { %v725_v45 = vadd.f32 %v2080_v10, %v724_v44 }
 0x144   : > { %v841_v46 = vpop.f32.mrf.mxu1 }
 0x145   : > { %v786_v47 = vmax.f32 %v725_v45, 0.0  ;;  %v842_v48 = vadd.f32 %v2167_v37, %v841_v46  ;;  %v755_v45 = vadd.f32 %v2080_v10, %v754_v40  ;;  %v1143_v46 = vld [vmem:[%s2433_s8 + $0x60] sm:$0xff] }
 0x146   : > { %1154 = vmatpush.msrb.mxu3 %v1143_v46 }
 0x147   : > { %888 = vmatmul.f32.gmra.mxu1 %v786_v47  ;;  %v935_v49 = vmax.f32 %v842_v48, 0.0  ;;  %v1142_v47 = vld [vmem:[%s2433_s8 + $0x58] sm:$0xff]  ;;  %v796_v48 = vmax.f32 %v755_v45, 0.0 }
 0x148   : > { %1155 = vmatpush.msrb.mxu3 %v1142_v47 }
 0x149   : > { %1005 = vmatmul.f32.gmra.mxu2 %v935_v49  ;;  %v1141_v49 = vld [vmem:[%s2433_s8 + $0x50] sm:$0xff] }
 0x14a   : > { %v727_v50 = vpop.f32.mrf.mxu0  ;;  %1156 = vmatpush.msrb.mxu3 %v1141_v49 }
 0x14b   : > { %v728_v51 = vadd.f32 %v2080_v10, %v727_v50 }
 0x14c   : > { %v844_v52 = vpop.f32.mrf.mxu1 }
 0x14d   : > { %v787_v53 = vmax.f32 %v728_v51, 0.0  ;;  %v845_v54 = vadd.f32 %v2167_v37, %v844_v52  ;;  %v1140_v52 = vld [vmem:[%s2433_s8 + $0x48] sm:$0xff] }
 0x14e   : > { %1157 = vmatpush.msrb.mxu3 %v1140_v52 }
 0x14f   : > { %891 = vmatmul.f32.gmra.mxu1 %v787_v53  ;;  %v936_v55 = vmax.f32 %v845_v54, 0.0  ;;  %v758_v54 = vadd.f32 %v2080_v10, %v757_v43 }
 0x151   : > { %1008 = vmatmul.f32.gmra.mxu2 %v936_v55  ;;  %v1139_v55 = vld [vmem:[%s2433_s8 + $0x40] sm:$0xff] }
 0x152   : > { %v730_v56 = vpop.f32.mrf.mxu0  ;;  %1158 = vmatpush.msrb.mxu3 %v1139_v55 }
 0x153   : > { %v731_v57 = vadd.f32 %v2080_v10, %v730_v56  ;;  %v760_v56 = vpop.f32.mrf.mxu3 }
 0x154   : > { %v847_v58 = vpop.f32.mrf.mxu1 }
 0x155   : > { %v788_v59 = vmax.f32 %v731_v57, 0.0  ;;  %v848_v60 = vadd.f32 %v2167_v37, %v847_v58  ;;  %v1138_v57 = vld [vmem:[%s2433_s8 + $0x38] sm:$0xff]  ;;  %v797_v58 = vmax.f32 %v758_v54, 0.0 }
 0x156   : > { %1159 = vmatpush.msrb.mxu3 %v1138_v57 }
 0x157   : > { %894 = vmatmul.f32.gmra.mxu1 %v788_v59  ;;  %v937_v61 = vmax.f32 %v848_v60, 0.0  ;;  %v1137_v59 = vld [vmem:[%s2433_s8 + $0x30] sm:$0xff] }
 0x158   : > { %1160 = vmatpush.msrb.mxu3 %v1137_v59 }
 0x159   : > { %1011 = vmatmul.f32.gmra.mxu2 %v937_v61 }
 0x15a   : > { %v733_v62 = vpop.f32.mrf.mxu0 }
 0x15b   : > { %v734_v63 = vadd.f32 %v2080_v10, %v733_v62  ;;  %v1136_v62 = vld [vmem:[%s2433_s8 + $0x28] sm:$0xff] }
 0x15c   : > { %v850_v0 = vpop.f32.mrf.mxu1  ;;  %1161 = vmatpush.msrb.mxu3 %v1136_v62 }
 0x15d   : > { %v789_v1 = vmax.f32 %v734_v63, 0.0  ;;  %v851_v2 = vadd.f32 %v2167_v37, %v850_v0  ;;  %v761_v0 = vadd.f32 %v2080_v10, %v760_v56 }
 0x15f   : > { %897 = vmatmul.f32.gmra.mxu1 %v789_v1  ;;  %v938_v3 = vmax.f32 %v851_v2, 0.0  ;;  %v1135_v1 = vld [vmem:[%s2433_s8 + $0x20] sm:$0xff]  ;;  %v1134_v2 = vld [vmem:[%s2433_s8 + $0x18] sm:$0xff]  ;;  %v798_v4 = vmax.f32 %v761_v0, 0.0 }
 0x160   : > { %1162 = vmatpush.msrb.mxu3 %v1135_v1 }
 0x161   : > { %1014 = vmatmul.f32.gmra.mxu2 %v938_v3  ;;  %v763_v3 = vpop.f32.mrf.mxu3 }
 0x162   : > { %1163 = vmatpush.msrb.mxu3 %v1134_v2  ;;  %v764_v11 = vadd.f32 %v2080_v10, %v763_v3 }
 0x164   : > { %v853_v5 = vpop.f32.mrf.mxu1 }
 0x165   : > { %v854_v7 = vadd.f32 %v2167_v37, %v853_v5  ;;  %v1133_v5 = vld [vmem:[%s2433_s8 + $0x10] sm:$0xff] }
 0x166   : > { %1164 = vmatpush.msrb.mxu3 %v1133_v5 }
 0x167   : > { %900 = vmatmul.f32.gmra.mxu1 %v790_v8  ;;  %v939_v9 = vmax.f32 %v854_v7, 0.0  ;;  %v1132_v8 = vld [vmem:[%s2433_s8 + $0x8] sm:$0xff] }
 0x168   : > { %1165 = vmatpush.msrb.mxu3 %v1132_v8 }
 0x169   : > { %1017 = vmatmul.f32.gmra.mxu2 %v939_v9  ;;  %v766_v15 = vpop.f32.mrf.mxu3 }
 0x16c   : > { %v856_v12 = vpop.f32.mrf.mxu1 }
 0x16d   : > { %v857_v14 = vadd.f32 %v2167_v37, %v856_v12  ;;  %v1131_v12 = vld [vmem:[%s2433_s8] sm:$0xff] }
 0x16e   : > { %1166 = vmatpush.msrb.mxu3 %v1131_v12 }
 0x16f   : > { %903 = vmatmul.f32.gmra.mxu1 %v791_v13  ;;  %v940_v16 = vmax.f32 %v857_v14, 0.0  ;;  %v799_v13 = vmax.f32 %v764_v11, 0.0 }
 0x171   : > { %1020 = vmatmul.f32.gmra.mxu2 %v940_v16 }
 0x174   : > { %v859_v19 = vpop.f32.mrf.mxu1 }
 0x175   : > { %v860_v20 = vadd.f32 %v2167_v37, %v859_v19 }
 0x177   : > { %906 = vmatmul.f32.gmra.mxu1 %v792_v18  ;;  %v941_v21 = vmax.f32 %v860_v20, 0.0  ;;  %v767_v18 = vadd.f32 %v2080_v10, %v766_v15 }
 0x179   : > { %1023 = vmatmul.f32.gmra.mxu2 %v941_v21  ;;  %v800_v19 = vmax.f32 %v767_v18, 0.0 }
 0x17c   : > { %v862_v25 = vpop.f32.mrf.mxu1 }
 0x17d   : > { %v863_v26 = vadd.f32 %v2167_v37, %v862_v25 }
 0x17f   : > { %909 = vmatmul.f32.gmra.mxu1 %v793_v24  ;;  %v942_v27 = vmax.f32 %v863_v26, 0.0  ;;  %v2253_v26 = vld [vmem:[%s2432_s7] ss:$0 sm:$0xff] }
 0x181   : > { %1026 = vmatmul.f32.gmra.mxu2 %v942_v27 }
 0x184   : > { %v865_v31 = vpop.f32.mrf.mxu1 }
 0x185   : > { %v866_v32 = vadd.f32 %v2167_v37, %v865_v31 }
 0x187   : > { %v943_v33 = vmax.f32 %v866_v32, 0.0  ;;  %912 = vmatmul.f32.gmra.mxu1 %v794_v30 }
 0x189   : > { %1029 = vmatmul.f32.gmra.mxu2 %v943_v33 }
 0x18c   : > { %v868_v39 = vpop.f32.mrf.mxu1 }
 0x18d   : > { %v869_v41 = vadd.f32 %v2167_v37, %v868_v39 }
 0x18f   : > { %v944_v44 = vmax.f32 %v869_v41, 0.0  ;;  %915 = vmatmul.f32.gmra.mxu1 %v795_v36 }
 0x191   : > { %1032 = vmatmul.f32.gmra.mxu2 %v944_v44 }
 0x194   : > { %v871_v50 = vpop.f32.mrf.mxu1 }
 0x195   : > { %v872_v51 = vadd.f32 %v2167_v37, %v871_v50 }
 0x197   : > { %v945_v53 = vmax.f32 %v872_v51, 0.0  ;;  %918 = vmatmul.f32.gmra.mxu1 %v796_v48 }
 0x199   : > { %1035 = vmatmul.f32.gmra.mxu2 %v945_v53 }
 0x19c   : > { %v874_v60 = vpop.f32.mrf.mxu1 }
 0x19d   : > { %v875_v61 = vadd.f32 %v2167_v37, %v874_v60 }
 0x19f   : > { %v946_v63 = vmax.f32 %v875_v61, 0.0  ;;  %921 = vmatmul.f32.gmra.mxu1 %v797_v58 }
 0x1a1   : > { %1038 = vmatmul.f32.gmra.mxu2 %v946_v63 }
 0x1a4   : > { %v877_v6 = vpop.f32.mrf.mxu1 }
 0x1a5   : > { %v878_v7 = vadd.f32 %v2167_v37, %v877_v6 }
 0x1a7   : > { %v947_v9 = vmax.f32 %v878_v7, 0.0  ;;  %924 = vmatmul.f32.gmra.mxu1 %v798_v4 }
 0x1a9   : > { %1041 = vmatmul.f32.gmra.mxu2 %v947_v9 }
 0x1ac   : > { %v880_v14 = vpop.f32.mrf.mxu1 }
 0x1ad   : > { %v881_v16 = vadd.f32 %v2167_v37, %v880_v14 }
 0x1af   : > { %v948_v17 = vmax.f32 %v881_v16, 0.0  ;;  %927 = vmatmul.f32.gmra.mxu1 %v799_v13 }
 0x1b1   : > { %1044 = vmatmul.f32.gmra.mxu2 %v948_v17 }
 0x1b4   : > { %v883_v20 = vpop.f32.mrf.mxu1 }
 0x1b5   : > { %v884_v21 = vadd.f32 %v2167_v37, %v883_v20 }
 0x1b7   : > { %v949_v22 = vmax.f32 %v884_v21, 0.0  ;;  %930 = vmatmul.f32.gmra.mxu1 %v800_v19 }
 0x1b9   : > { %1047 = vmatmul.f32.gmra.mxu2 %v949_v22 }
 0x1bc   : > { %v886_v23 = vpop.f32.mrf.mxu1 }
 0x1bd   : > { %v887_v24 = vadd.f32 %v2167_v37, %v886_v23 }
 0x1bf   : > { %v950_v25 = vmax.f32 %v887_v24, 0.0 }
 0x1c1   : > { %1050 = vmatmul.f32.gmra.mxu2 %v950_v25 }
 0x1c2   : > { %v1003_v10 = vpop.f32.mrf.mxu2 }
 0x1c3   : > { %v1004_v29 = vadd.f32 %v2253_v26, %v1003_v10 }
 0x1c4   : > { %v889_v27 = vpop.f32.mrf.mxu1 }
 0x1c5   : > { %v890_v28 = vadd.f32 %v2167_v37, %v889_v27  ;;  %v1099_v31 = vmax.f32 %v1004_v29, 0.0 }
 0x1c7   : > { %v951_v30 = vmax.f32 %v890_v28, 0.0  ;;  %1167 = vmatmul.f32.vlgmr.msrb.gmra.mxu3 %v1099_v31 }
 0x1c9   : > { %1053 = vmatmul.f32.gmra.mxu2 %v951_v30 }
 0x1cc   : > { %v892_v32 = vpop.f32.mrf.mxu1  ;;  %v1006_v33 = vpop.f32.mrf.mxu2 }
 0x1cd   : > { %v893_v34 = vadd.f32 %v2167_v37, %v892_v32  ;;  %v1007_v35 = vadd.f32 %v2253_v26, %v1006_v33 }
 0x1cf   : > { %v952_v36 = vmax.f32 %v893_v34, 0.0  ;;  %v1100_v38 = vmax.f32 %v1007_v35, 0.0 }
 0x1d1   : > { %1056 = vmatmul.f32.gmra.mxu2 %v952_v36  ;;  %1170 = vmatmul.f32.gmra.mxu3 %v1100_v38 }
 0x1d4   : > { %v895_v39 = vpop.f32.mrf.mxu1  ;;  %v1009_v40 = vpop.f32.mrf.mxu2 }
 0x1d5   : > { %v896_v41 = vadd.f32 %v2167_v37, %v895_v39  ;;  %v1010_v42 = vadd.f32 %v2253_v26, %v1009_v40 }
 0x1d7   : > { %v953_v43 = vmax.f32 %v896_v41, 0.0  ;;  %v1101_v44 = vmax.f32 %v1010_v42, 0.0 }
 0x1d9   : > { %1059 = vmatmul.f32.gmra.mxu2 %v953_v43  ;;  %1173 = vmatmul.f32.gmra.mxu3 %v1101_v44 }
 0x1dc   : > { %v898_v45 = vpop.f32.mrf.mxu1  ;;  %v1012_v46 = vpop.f32.mrf.mxu2 }
 0x1dd   : > { %v899_v47 = vadd.f32 %v2167_v37, %v898_v45  ;;  %v1013_v48 = vadd.f32 %v2253_v26, %v1012_v46 }
 0x1df   : > { %v954_v49 = vmax.f32 %v899_v47, 0.0  ;;  %v1102_v50 = vmax.f32 %v1013_v48, 0.0 }
 0x1e1   : > { %1062 = vmatmul.f32.gmra.mxu2 %v954_v49  ;;  %1176 = vmatmul.f32.gmra.mxu3 %v1102_v50 }
 0x1e4   : > { %v901_v51 = vpop.f32.mrf.mxu1  ;;  %v1015_v52 = vpop.f32.mrf.mxu2 }
 0x1e5   : > { %v902_v53 = vadd.f32 %v2167_v37, %v901_v51  ;;  %v1016_v54 = vadd.f32 %v2253_v26, %v1015_v52 }
 0x1e7   : > { %v955_v55 = vmax.f32 %v902_v53, 0.0  ;;  %v1103_v56 = vmax.f32 %v1016_v54, 0.0 }
 0x1e9   : > { %1065 = vmatmul.f32.gmra.mxu2 %v955_v55  ;;  %1179 = vmatmul.f32.gmra.mxu3 %v1103_v56 }
 0x1ec   : > { %v904_v57 = vpop.f32.mrf.mxu1  ;;  %v1018_v58 = vpop.f32.mrf.mxu2 }
 0x1ed   : > { %v905_v59 = vadd.f32 %v2167_v37, %v904_v57  ;;  %v1019_v60 = vadd.f32 %v2253_v26, %v1018_v58 }
 0x1ef   : > { %v956_v61 = vmax.f32 %v905_v59, 0.0  ;;  %v1104_v62 = vmax.f32 %v1019_v60, 0.0 }
 0x1f1   : > { %1068 = vmatmul.f32.gmra.mxu2 %v956_v61  ;;  %1182 = vmatmul.f32.gmra.mxu3 %v1104_v62 }
 0x1f4   : > { %v907_v63 = vpop.f32.mrf.mxu1  ;;  %v1021_v0 = vpop.f32.mrf.mxu2 }
 0x1f5   : > { %v908_v1 = vadd.f32 %v2167_v37, %v907_v63  ;;  %v1022_v2 = vadd.f32 %v2253_v26, %v1021_v0 }
 0x1f7   : > { %v957_v3 = vmax.f32 %v908_v1, 0.0  ;;  %v1105_v4 = vmax.f32 %v1022_v2, 0.0 }
 0x1f9   : > { %1071 = vmatmul.f32.gmra.mxu2 %v957_v3  ;;  %1185 = vmatmul.f32.gmra.mxu3 %v1105_v4 }
 0x1fc   : > { %v910_v5 = vpop.f32.mrf.mxu1  ;;  %v1024_v6 = vpop.f32.mrf.mxu2 }
 0x1fd   : > { %v911_v7 = vadd.f32 %v2167_v37, %v910_v5  ;;  %v1025_v8 = vadd.f32 %v2253_v26, %v1024_v6 }
 0x1ff   : > { %v958_v9 = vmax.f32 %v911_v7, 0.0  ;;  %v1106_v11 = vmax.f32 %v1025_v8, 0.0 }
 0x201   : > { %1074 = vmatmul.f32.gmra.mxu2 %v958_v9  ;;  %1188 = vmatmul.f32.gmra.mxu3 %v1106_v11 }
 0x204   : > { %v913_v12 = vpop.f32.mrf.mxu1  ;;  %v1027_v13 = vpop.f32.mrf.mxu2 }
 0x205   : > { %v914_v14 = vadd.f32 %v2167_v37, %v913_v12  ;;  %v1028_v15 = vadd.f32 %v2253_v26, %v1027_v13 }
 0x207   : > { %v959_v16 = vmax.f32 %v914_v14, 0.0  ;;  %v1107_v17 = vmax.f32 %v1028_v15, 0.0 }
 0x209   : > { %1077 = vmatmul.f32.gmra.mxu2 %v959_v16  ;;  %1191 = vmatmul.f32.gmra.mxu3 %v1107_v17 }
 0x20c   : > { %v916_v18 = vpop.f32.mrf.mxu1  ;;  %v1030_v19 = vpop.f32.mrf.mxu2 }
 0x20d   : > { %v917_v20 = vadd.f32 %v2167_v37, %v916_v18  ;;  %v1031_v21 = vadd.f32 %v2253_v26, %v1030_v19 }
 0x20f   : > { %v960_v22 = vmax.f32 %v917_v20, 0.0  ;;  %v1108_v23 = vmax.f32 %v1031_v21, 0.0 }
 0x211   : > { %1080 = vmatmul.f32.gmra.mxu2 %v960_v22  ;;  %1194 = vmatmul.f32.gmra.mxu3 %v1108_v23 }
 0x214   : > { %v919_v24 = vpop.f32.mrf.mxu1  ;;  %v1033_v25 = vpop.f32.mrf.mxu2 }
 0x215   : > { %v920_v27 = vadd.f32 %v2167_v37, %v919_v24  ;;  %v1034_v10 = vadd.f32 %v2253_v26, %v1033_v25 }
 0x217   : > { %v961_v28 = vmax.f32 %v920_v27, 0.0  ;;  %v1109_v29 = vmax.f32 %v1034_v10, 0.0 }
 0x219   : > { %1083 = vmatmul.f32.gmra.mxu2 %v961_v28  ;;  %1197 = vmatmul.f32.gmra.mxu3 %v1109_v29 }
 0x21c   : > { %v922_v30 = vpop.f32.mrf.mxu1  ;;  %v1036_v31 = vpop.f32.mrf.mxu2 }
 0x21d   : > { %v923_v32 = vadd.f32 %v2167_v37, %v922_v30  ;;  %v1037_v33 = vadd.f32 %v2253_v26, %v1036_v31 }
 0x21f   : > { %v962_v34 = vmax.f32 %v923_v32, 0.0  ;;  %v1110_v35 = vmax.f32 %v1037_v33, 0.0  ;;  %v1327_v33 = vld [vmem:[#allocation4 + $0x78] sm:$0xff] }
 0x220   : > { %1332 = vmatpush.msrb.mxu0 %v1327_v33 }
 0x221   : > { %1086 = vmatmul.f32.gmra.mxu2 %v962_v34  ;;  %1200 = vmatmul.f32.gmra.mxu3 %v1110_v35 }
 0x224   : > { %v925_v36 = vpop.f32.mrf.mxu1  ;;  %v1039_v38 = vpop.f32.mrf.mxu2 }
 0x225   : > { %v926_v39 = vadd.f32 %v2167_v37, %v925_v36  ;;  %v1040_v40 = vadd.f32 %v2253_v26, %v1039_v38  ;;  %v1326_v38 = vld [vmem:[#allocation4 + $0x70] sm:$0xff] }
 0x226   : > { %1333 = vmatpush.msrb.mxu0 %v1326_v38 }
 0x227   : > { %v963_v41 = vmax.f32 %v926_v39, 0.0  ;;  %v1111_v42 = vmax.f32 %v1040_v40, 0.0  ;;  %v1325_v40 = vld [vmem:[#allocation4 + $0x68] sm:$0xff] }
 0x228   : > { %1334 = vmatpush.msrb.mxu0 %v1325_v40 }
 0x229   : > { %1089 = vmatmul.f32.gmra.mxu2 %v963_v41  ;;  %1203 = vmatmul.f32.gmra.mxu3 %v1111_v42  ;;  %v1324_v41 = vld [vmem:[#allocation4 + $0x60] sm:$0xff]  ;;  %v1323_v42 = vld [vmem:[#allocation4 + $0x58] sm:$0xff] }
 0x22a   : > { %1335 = vmatpush.msrb.mxu0 %v1324_v41 }
 0x22c   : > { %v928_v43 = vpop.f32.mrf.mxu1  ;;  %v1042_v44 = vpop.f32.mrf.mxu2  ;;  %1336 = vmatpush.msrb.mxu0 %v1323_v42 }
 0x22d   : > { %v929_v45 = vadd.f32 %v2167_v37, %v928_v43  ;;  %v1043_v46 = vadd.f32 %v2253_v26, %v1042_v44 }
 0x22f   : > { %v964_v47 = vmax.f32 %v929_v45, 0.0  ;;  %v1112_v48 = vmax.f32 %v1043_v46, 0.0  ;;  %v1322_v46 = vld [vmem:[#allocation4 + $0x50] sm:$0xff] }
 0x230   : > { %1337 = vmatpush.msrb.mxu0 %v1322_v46 }
 0x231   : > { %1092 = vmatmul.f32.gmra.mxu2 %v964_v47  ;;  %1206 = vmatmul.f32.gmra.mxu3 %v1112_v48  ;;  %v1321_v48 = vld [vmem:[#allocation4 + $0x48] sm:$0xff] }
 0x232   : > { %1338 = vmatpush.msrb.mxu0 %v1321_v48 }
 0x234   : > { %v931_v49 = vpop.f32.mrf.mxu1  ;;  %v1045_v50 = vpop.f32.mrf.mxu2 }
 0x235   : > { %v932_v51 = vadd.f32 %v2167_v37, %v931_v49  ;;  %v1046_v52 = vadd.f32 %v2253_v26, %v1045_v50  ;;  %v1320_v49 = vld [vmem:[#allocation4 + $0x40] sm:$0xff]  ;;  %v1319_v50 = vld [vmem:[#allocation4 + $0x38] sm:$0xff] }
 0x236   : > { %1339 = vmatpush.msrb.mxu0 %v1320_v49 }
 0x237   : > { %v965_v53 = vmax.f32 %v932_v51, 0.0  ;;  %v1113_v54 = vmax.f32 %v1046_v52, 0.0 }
 0x238   : > { %1340 = vmatpush.msrb.mxu0 %v1319_v50 }
 0x239   : > { %1095 = vmatmul.f32.gmra.mxu2 %v965_v53  ;;  %1209 = vmatmul.f32.gmra.mxu3 %v1113_v54  ;;  %v1318_v54 = vld [vmem:[#allocation4 + $0x30] sm:$0xff] }
 0x23a   : > { %1341 = vmatpush.msrb.mxu0 %v1318_v54 }
 0x23c   : > { %v1048_v55 = vpop.f32.mrf.mxu2 }
 0x23d   : > { %v1049_v56 = vadd.f32 %v2253_v26, %v1048_v55 }
 0x23f   : > { %v1114_v57 = vmax.f32 %v1049_v56, 0.0  ;;  %v1317_v56 = vld [vmem:[#allocation4 + $0x28] sm:$0xff] }
 0x240   : > { %1342 = vmatpush.msrb.mxu0 %v1317_v56 }
 0x241   : > { %1212 = vmatmul.f32.gmra.mxu3 %v1114_v57  ;;  %v1316_v57 = vld [vmem:[#allocation4 + $0x20] sm:$0xff] }
 0x242   : > { %1343 = vmatpush.msrb.mxu0 %v1316_v57 }
 0x244   : > { %v1051_v58 = vpop.f32.mrf.mxu2 }
 0x245   : > { %v1052_v59 = vadd.f32 %v2253_v26, %v1051_v58  ;;  %v1315_v58 = vld [vmem:[#allocation4 + $0x18] sm:$0xff] }
 0x246   : > { %1344 = vmatpush.msrb.mxu0 %v1315_v58 }
 0x247   : > { %v1115_v60 = vmax.f32 %v1052_v59, 0.0 }
 0x249   : > { %1215 = vmatmul.f32.gmra.mxu3 %v1115_v60 }
 0x24a   : > { %v2287_v62 = vpop.f32.mrf.mxu3 }
 0x24c   : > { %v1054_v61 = vpop.f32.mrf.mxu2 }
 0x24d   : > { %v1055_v37 = vadd.f32 %v2253_v26, %v1054_v61 }
 0x24f   : > { %v1116_v63 = vmax.f32 %v1055_v37, 0.0  ;;  %v1314_v37 = vld [vmem:[#allocation4 + $0x10] sm:$0xff] }
 0x250   : > { %1345 = vmatpush.msrb.mxu0 %v1314_v37 }
 0x251   : > { %1218 = vmatmul.f32.gmra.mxu3 %v1116_v63 }
 0x254   : > { %v1057_v0 = vpop.f32.mrf.mxu2  ;;  %v2290_v1 = vpop.f32.mrf.mxu3 }
 0x255   : > { %v1058_v2 = vadd.f32 %v2253_v26, %v1057_v0  ;;  %v1313_v0 = vld [vmem:[#allocation4 + $0x8] sm:$0xff] }
 0x256   : > { %1346 = vmatpush.msrb.mxu0 %v1313_v0 }
 0x257   : > { %v1117_v3 = vmax.f32 %v1058_v2, 0.0  ;;  %v1312_v2 = vld [vmem:[#allocation4] sm:$0xff] }
 0x258   : > { %1347 = vmatpush.msrb.mxu0 %v1312_v2 }
 0x259   : > { %1221 = vmatmul.f32.gmra.mxu3 %v1117_v3 }
 0x25c   : > { %v1060_v4 = vpop.f32.mrf.mxu2  ;;  %v2293_v5 = vpop.f32.mrf.mxu3 }
 0x25d   : > { %v1061_v6 = vadd.f32 %v2253_v26, %v1060_v4 }
 0x25f   : > { %v1118_v7 = vmax.f32 %v1061_v6, 0.0 }
 0x261   : > { %1224 = vmatmul.f32.gmra.mxu3 %v1118_v7 }
 0x264   : > { %v1063_v8 = vpop.f32.mrf.mxu2  ;;  %v2296_v9 = vpop.f32.mrf.mxu3 }
 0x265   : > { %v1064_v11 = vadd.f32 %v2253_v26, %v1063_v8 }
 0x267   : > { %v1119_v12 = vmax.f32 %v1064_v11, 0.0 }
 0x269   : > { %1227 = vmatmul.f32.gmra.mxu3 %v1119_v12 }
 0x26c   : > { %v1066_v13 = vpop.f32.mrf.mxu2  ;;  %v2299_v14 = vpop.f32.mrf.mxu3 }
 0x26d   : > { %v1067_v15 = vadd.f32 %v2253_v26, %v1066_v13 }
 0x26f   : > { %v1120_v16 = vmax.f32 %v1067_v15, 0.0 }
 0x271   : > { %1230 = vmatmul.f32.gmra.mxu3 %v1120_v16  ;;  %v2337_v16 = vld [vmem:[%s2434_s9] ss:$0 sm:$0xff] }
 0x274   : > { %v1069_v17 = vpop.f32.mrf.mxu2  ;;  %v2302_v18 = vpop.f32.mrf.mxu3 }
 0x275   : > { %v1070_v19 = vadd.f32 %v2253_v26, %v1069_v17  ;;  %v1169_v17 = vadd.f32 %v2337_v16, %v2287_v62 }
 0x277   : > { %v1121_v20 = vmax.f32 %v1070_v19, 0.0 }
 0x279   : > { %1233 = vmatmul.f32.gmra.mxu3 %v1121_v20 }
 0x27c   : > { %v1072_v21 = vpop.f32.mrf.mxu2  ;;  %v2305_v22 = vpop.f32.mrf.mxu3 }
 0x27d   : > { %v1073_v23 = vadd.f32 %v2253_v26, %v1072_v21  ;;  %v1264_v21 = vmax.f32 %v1169_v17, 0.0 }
 0x27f   : > { %v1122_v24 = vmax.f32 %v1073_v23, 0.0 }
 0x281   : > { %1236 = vmatmul.f32.gmra.mxu3 %v1122_v24 }
 0x284   : > { %v1075_v25 = vpop.f32.mrf.mxu2  ;;  %v2308_v27 = vpop.f32.mrf.mxu3 }
 0x285   : > { %v1076_v10 = vadd.f32 %v2253_v26, %v1075_v25 }
 0x287   : > { %v1123_v28 = vmax.f32 %v1076_v10, 0.0 }
 0x289   : > { %1239 = vmatmul.f32.gmra.mxu3 %v1123_v28 }
 0x28c   : > { %v1078_v29 = vpop.f32.mrf.mxu2  ;;  %v2311_v30 = vpop.f32.mrf.mxu3 }
 0x28d   : > { %v1079_v31 = vadd.f32 %v2253_v26, %v1078_v29 }
 0x28f   : > { %v1124_v32 = vmax.f32 %v1079_v31, 0.0 }
 0x291   : > { %1242 = vmatmul.f32.gmra.mxu3 %v1124_v32  ;;  %v1175_v32 = vadd.f32 %v2337_v16, %v2293_v5  ;;  %v1181_v5 = vadd.f32 %v2337_v16, %v2299_v14  ;;  %v1187_v14 = vadd.f32 %v2337_v16, %v2305_v22  ;;  %v1193_v22 = vadd.f32 %v2337_v16, %v2311_v30 }
 0x293   : > { %v1270_v58 = vmax.f32 %v1187_v14, 0.0 }
 0x294   : > { %v1081_v34 = vpop.f32.mrf.mxu2  ;;  %v2314_v35 = vpop.f32.mrf.mxu3 }
 0x295   : > { %v1082_v36 = vadd.f32 %v2253_v26, %v1081_v34  ;;  %v1266_v34 = vmax.f32 %v1175_v32, 0.0 }
 0x297   : > { %v1125_v39 = vmax.f32 %v1082_v36, 0.0 }
 0x299   : > { %1245 = vmatmul.f32.gmra.mxu3 %v1125_v39 }
 0x29c   : > { %v1084_v43 = vpop.f32.mrf.mxu2  ;;  %v2317_v44 = vpop.f32.mrf.mxu3 }
 0x29d   : > { %v1085_v45 = vadd.f32 %v2253_v26, %v1084_v43  ;;  %v1199_v30 = vadd.f32 %v2337_v16, %v2317_v44 }
 0x29f   : > { %v1126_v47 = vmax.f32 %v1085_v45, 0.0 }
 0x2a1   : > { %1248 = vmatmul.f32.gmra.mxu3 %v1126_v47  ;;  %v1268_v47 = vmax.f32 %v1181_v5, 0.0 }
 0x2a4   : > { %v1087_v51 = vpop.f32.mrf.mxu2  ;;  %v2320_v52 = vpop.f32.mrf.mxu3 }
 0x2a5   : > { %v1088_v53 = vadd.f32 %v2253_v26, %v1087_v51 }
 0x2a7   : > { %v1127_v55 = vmax.f32 %v1088_v53, 0.0 }
 0x2a9   : > { %1251 = vmatmul.f32.gmra.mxu3 %v1127_v55 }
 0x2ac   : > { %v1090_v59 = vpop.f32.mrf.mxu2  ;;  %v2323_v60 = vpop.f32.mrf.mxu3 }
 0x2ad   : > { %v1091_v61 = vadd.f32 %v2253_v26, %v1090_v59  ;;  %v1205_v44 = vadd.f32 %v2337_v16, %v2323_v60 }
 0x2af   : > { %v1128_v63 = vmax.f32 %v1091_v61, 0.0 }
 0x2b1   : > { %1254 = vmatmul.f32.gmra.mxu3 %v1128_v63 }
 0x2b4   : > { %v1093_v3 = vpop.f32.mrf.mxu2  ;;  %v2326_v4 = vpop.f32.mrf.mxu3 }
 0x2b5   : > { %v1094_v6 = vadd.f32 %v2253_v26, %v1093_v3 }
 0x2b7   : > { %v1129_v7 = vmax.f32 %v1094_v6, 0.0 }
 0x2b9   : > { %1257 = vmatmul.f32.gmra.mxu3 %v1129_v7 }
 0x2bc   : > { %v1096_v8 = vpop.f32.mrf.mxu2  ;;  %v2329_v11 = vpop.f32.mrf.mxu3 }
 0x2bd   : > { %v1097_v12 = vadd.f32 %v2253_v26, %v1096_v8  ;;  %v1172_v26 = vadd.f32 %v2337_v16, %v2290_v1  ;;  %v1178_v1 = vadd.f32 %v2337_v16, %v2296_v9  ;;  %v1184_v9 = vadd.f32 %v2337_v16, %v2302_v18 }
 0x2be   : > { %v1190_v18 = vadd.f32 %v2337_v16, %v2308_v27  ;;  %v1272_v8 = vmax.f32 %v1193_v22, 0.0  ;;  %v1196_v27 = vadd.f32 %v2337_v16, %v2314_v35  ;;  %v1202_v35 = vadd.f32 %v2337_v16, %v2320_v52 }
 0x2bf   : > { %v1130_v13 = vmax.f32 %v1097_v12, 0.0  ;;  %v1265_v28 = vmax.f32 %v1172_v26, 0.0  ;;  %v1267_v41 = vmax.f32 %v1178_v1, 0.0  ;;  %v1269_v53 = vmax.f32 %v1184_v9, 0.0 }
 0x2c0   : > { %v1271_v0 = vmax.f32 %v1190_v18, 0.0  ;;  %v1275_v32 = vmax.f32 %v1202_v35, 0.0  ;;  %v1208_v52 = vadd.f32 %v2337_v16, %v2326_v4  ;;  %v1211_v60 = vadd.f32 %v2337_v16, %v2329_v11 }
 0x2c1   : > { %1260 = vmatmul.f32.gmra.mxu3 %v1130_v13 }
 0x2c4   : > { %v2332_v15 = vpop.f32.mrf.mxu3 }
 0x2c5   : > { %v1214_v4 = vadd.f32 %v2337_v16, %v2332_v15 }
 0x2cc   : > { %v1216_v19 = vpop.f32.mrf.mxu3 }
 0x2cd   : > { %v1217_v20 = vadd.f32 %v2337_v16, %v1216_v19 }
 0x2cf   : > { %v1280_v23 = vmax.f32 %v1217_v20, 0.0  ;;  %v1273_v20 = vmax.f32 %v1196_v27, 0.0 }
 0x2d1   : > { %v1296_v24 = vadd.f32 %v1280_v23, %v1264_v21 }
 0x2d3   : > { %1348 = vmatmul.f32.vlgmr.msrb.gmra.mxu0 %v1296_v24 }
 0x2d4   : > { %v1219_v25 = vpop.f32.mrf.mxu3 }
 0x2d5   : > { %v1220_v10 = vadd.f32 %v2337_v16, %v1219_v25  ;;  %v1274_v25 = vmax.f32 %v1199_v30, 0.0 }
 0x2d7   : > { %v1281_v29 = vmax.f32 %v1220_v10, 0.0 }
 0x2d9   : > { %v1297_v31 = vadd.f32 %v1281_v29, %v1265_v28 }
 0x2db   : > { %1351 = vmatmul.f32.gmra.mxu0 %v1297_v31 }
 0x2dc   : > { %v1222_v62 = vpop.f32.mrf.mxu3 }
 0x2dd   : > { %v1223_v33 = vadd.f32 %v2337_v16, %v1222_v62 }
 0x2df   : > { %v1282_v36 = vmax.f32 %v1223_v33, 0.0 }
 0x2e1   : > { %v1298_v38 = vadd.f32 %v1282_v36, %v1266_v34 }
 0x2e3   : > { %1354 = vmatmul.f32.gmra.mxu0 %v1298_v38  ;;  %v1276_v38 = vmax.f32 %v1205_v44, 0.0 }
 0x2e4   : > { %v1225_v39 = vpop.f32.mrf.mxu3 }
 0x2e5   : > { %v1226_v40 = vadd.f32 %v2337_v16, %v1225_v39 }
 0x2e7   : > { %v1283_v42 = vmax.f32 %v1226_v40, 0.0 }
 0x2e9   : > { %v1299_v43 = vadd.f32 %v1283_v42, %v1267_v41  ;;  %v1277_v42 = vmax.f32 %v1208_v52, 0.0 }
 0x2eb   : > { %1357 = vmatmul.f32.gmra.mxu0 %v1299_v43 }
 0x2ec   : > { %v1228_v45 = vpop.f32.mrf.mxu3 }
 0x2ed   : > { %v1229_v46 = vadd.f32 %v2337_v16, %v1228_v45 }
 0x2ef   : > { %v1284_v48 = vmax.f32 %v1229_v46, 0.0 }
 0x2f1   : > { %v1300_v49 = vadd.f32 %v1284_v48, %v1268_v47  ;;  %v1278_v47 = vmax.f32 %v1211_v60, 0.0 }
 0x2f3   : > { %1360 = vmatmul.f32.gmra.mxu0 %v1300_v49 }
 0x2f4   : > { %v1231_v50 = vpop.f32.mrf.mxu3 }
 0x2f5   : > { %v1232_v51 = vadd.f32 %v2337_v16, %v1231_v50 }
 0x2f7   : > { %v1285_v54 = vmax.f32 %v1232_v51, 0.0  ;;  %v1279_v51 = vmax.f32 %v1214_v4, 0.0 }
 0x2f9   : > { %v1301_v55 = vadd.f32 %v1285_v54, %v1269_v53 }
 0x2fb   : > { %1363 = vmatmul.f32.gmra.mxu0 %v1301_v55 }
 0x2fc   : > { %v1234_v56 = vpop.f32.mrf.mxu3 }
 0x2fd   : > { %v1235_v57 = vadd.f32 %v2337_v16, %v1234_v56 }
 0x2ff   : > { %v1286_v59 = vmax.f32 %v1235_v57, 0.0 }
 0x301   : > { %v1302_v61 = vadd.f32 %v1286_v59, %v1270_v58 }
 0x303   : > { %1366 = vmatmul.f32.gmra.mxu0 %v1302_v61 }
 0x304   : > { %v1237_v37 = vpop.f32.mrf.mxu3 }
 0x305   : > { %v1238_v63 = vadd.f32 %v2337_v16, %v1237_v37 }
 0x307   : > { %v1287_v2 = vmax.f32 %v1238_v63, 0.0 }
 0x309   : > { %v1303_v3 = vadd.f32 %v1287_v2, %v1271_v0 }
 0x30b   : > { %1369 = vmatmul.f32.gmra.mxu0 %v1303_v3 }
 0x30c   : > { %v1240_v6 = vpop.f32.mrf.mxu3 }
 0x30d   : > { %v1241_v7 = vadd.f32 %v2337_v16, %v1240_v6 }
 0x30f   : > { %v1288_v12 = vmax.f32 %v1241_v7, 0.0 }
 0x311   : > { %v1304_v13 = vadd.f32 %v1288_v12, %v1272_v8 }
 0x313   : > { %1372 = vmatmul.f32.gmra.mxu0 %v1304_v13 }
 0x314   : > { %v1243_v17 = vpop.f32.mrf.mxu3 }
 0x315   : > { %v1244_v19 = vadd.f32 %v2337_v16, %v1243_v17 }
 0x317   : > { %v1289_v21 = vmax.f32 %v1244_v19, 0.0 }
 0x319   : > { %v1305_v23 = vadd.f32 %v1289_v21, %v1273_v20 }
 0x31b   : > { %1375 = vmatmul.f32.gmra.mxu0 %v1305_v23 }
 0x31c   : > { %v1246_v24 = vpop.f32.mrf.mxu3 }
 0x31d   : > { %v1247_v26 = vadd.f32 %v2337_v16, %v1246_v24 }
 0x31f   : > { %v1290_v10 = vmax.f32 %v1247_v26, 0.0 }
 0x321   : > { %v1306_v28 = vadd.f32 %v1290_v10, %v1274_v25 }
 0x323   : > { %1378 = vmatmul.f32.gmra.mxu0 %v1306_v28 }
 0x324   : > { %v1249_v29 = vpop.f32.mrf.mxu3 }
 0x325   : > { %v1250_v31 = vadd.f32 %v2337_v16, %v1249_v29 }
 0x327   : > { %v1291_v62 = vmax.f32 %v1250_v31, 0.0 }
 0x329   : > { %v1307_v33 = vadd.f32 %v1291_v62, %v1275_v32 }
 0x32b   : > { %1381 = vmatmul.f32.gmra.mxu0 %v1307_v33 }
 0x32c   : > { %v1252_v34 = vpop.f32.mrf.mxu3 }
 0x32d   : > { %v1253_v36 = vadd.f32 %v2337_v16, %v1252_v34 }
 0x32f   : > { %v1292_v1 = vmax.f32 %v1253_v36, 0.0 }
 0x331   : > { %v1308_v39 = vadd.f32 %v1292_v1, %v1276_v38 }
 0x333   : > { %1384 = vmatmul.f32.gmra.mxu0 %v1308_v39 }
 0x334   : > { %v1255_v40 = vpop.f32.mrf.mxu3 }
 0x335   : > { %v1256_v41 = vadd.f32 %v2337_v16, %v1255_v40 }
 0x337   : > { %v1293_v43 = vmax.f32 %v1256_v41, 0.0 }
 0x339   : > { %v1309_v5 = vadd.f32 %v1293_v43, %v1277_v42  ;;  %v1413_v42 = vld [vmem:[%s2437_s12] sm:$0x1]  ;;  %v1415_v43 = vstv %s1414_s26 }
 0x33b   : > { %1387 = vmatmul.f32.gmra.mxu0 %v1309_v5 }
 0x33c   : > { %v1258_v45 = vpop.f32.mrf.mxu3 }
 0x33d   : > { %v1259_v46 = vadd.f32 %v2337_v16, %v1258_v45 }
 0x33f   : > { %v1294_v48 = vmax.f32 %v1259_v46, 0.0 }
 0x341   : > { %v1310_v49 = vadd.f32 %v1294_v48, %v1278_v47 }
 0x343   : > { %1390 = vmatmul.f32.gmra.mxu0 %v1310_v49 }
 0x344   : > { %v1261_v9 = vpop.f32.mrf.mxu3 }
 0x345   : > { %v1262_v50 = vadd.f32 %v2337_v16, %v1261_v9  ;;  %v1646_v16 = vld [vmem:[%s2436_s11] ss:$0 sm:$0xff] }
 0x347   : > { %v1295_v53 = vmax.f32 %v1262_v50, 0.0 }
 0x349   : > { %v1311_v54 = vadd.f32 %v1295_v53, %v1279_v51 }
 0x34b   : > { %1393 = vmatmul.f32.gmra.mxu0 %v1311_v54 }
 0x350   : > { %v1349_v55 = vpop.f32.mrf.mxu0 }
 0x351   : > { %v1350_v52 = vadd.f32 %v1646_v16, %v1349_v55 }
 0x353   : > { %v1397_v41 = vmax.f32 %v1350_v52, 0.0 }
 0x358   : > { %v1352_v11 = vpop.f32.mrf.mxu0 }
 0x359   : > { %v1353_v1 = vadd.f32 %v1646_v16, %v1352_v11 }
 0x35b   : > { %v1398_v40 = vmax.f32 %v1353_v1, 0.0 }
 0x360   : > { %v1355_v14 = vpop.f32.mrf.mxu0 }
 0x361   : > { %v1356_v36 = vadd.f32 %v1646_v16, %v1355_v14 }
 0x363   : > { %v1399_v39 = vmax.f32 %v1356_v36, 0.0 }
 0x368   : > { %v1358_v56 = vpop.f32.mrf.mxu0 }
 0x369   : > { %v1359_v44 = vadd.f32 %v1646_v16, %v1358_v56 }
 0x36b   : > { %v1400_v38 = vmax.f32 %v1359_v44, 0.0 }
 0x370   : > { %v1361_v57 = vpop.f32.mrf.mxu0 }
 0x371   : > { %v1362_v62 = vadd.f32 %v1646_v16, %v1361_v57 }
 0x373   : > { %v1401_v34 = vmax.f32 %v1362_v62, 0.0 }
 0x378   : > { %v1364_v58 = vpop.f32.mrf.mxu0 }
 0x379   : > { %v1365_v31 = vadd.f32 %v1646_v16, %v1364_v58 }
 0x37b   : > { %v1402_v33 = vmax.f32 %v1365_v31, 0.0 }
 0x380   : > { %v1367_v59 = vpop.f32.mrf.mxu0 }
 0x381   : > { %v1368_v35 = vadd.f32 %v1646_v16, %v1367_v59 }
 0x383   : > { %v1403_v32 = vmax.f32 %v1368_v35, 0.0 }
 0x388   : > { %v1370_v61 = vpop.f32.mrf.mxu0 }
 0x389   : > { %v1371_v10 = vadd.f32 %v1646_v16, %v1370_v61 }
 0x38b   : > { %v1404_v29 = vmax.f32 %v1371_v10, 0.0 }
 0x390   : > { %v1373_v18 = vpop.f32.mrf.mxu0 }
 0x391   : > { %v1374_v26 = vadd.f32 %v1646_v16, %v1373_v18 }
 0x393   : > { %v1405_v28 = vmax.f32 %v1374_v26, 0.0 }
 0x398   : > { %v1376_v37 = vpop.f32.mrf.mxu0 }
 0x399   : > { %v1377_v30 = vadd.f32 %v1646_v16, %v1376_v37 }
 0x39b   : > { %v1406_v25 = vmax.f32 %v1377_v30, 0.0 }
 0x3a0   : > { %v1379_v63 = vpop.f32.mrf.mxu0 }
 0x3a1   : > { %v1380_v21 = vadd.f32 %v1646_v16, %v1379_v63 }
 0x3a3   : > { %v1407_v24 = vmax.f32 %v1380_v21, 0.0 }
 0x3a8   : > { %v1382_v15 = vpop.f32.mrf.mxu0 }
 0x3a9   : > { %v1383_v19 = vadd.f32 %v1646_v16, %v1382_v15 }
 0x3ab   : > { %v1408_v23 = vmax.f32 %v1383_v19, 0.0 }
 0x3b0   : > { %v1385_v0 = vpop.f32.mrf.mxu0 }
 0x3b1   : > { %v1386_v27 = vadd.f32 %v1646_v16, %v1385_v0 }
 0x3b3   : > { %v1409_v20 = vmax.f32 %v1386_v27, 0.0 }
 0x3b8   : > { %v1388_v2 = vpop.f32.mrf.mxu0 }
 0x3b9   : > { %v1389_v12 = vadd.f32 %v1646_v16, %v1388_v2 }
 0x3bb   : > { %v1410_v17 = vmax.f32 %v1389_v12, 0.0 }
 0x3c0   : > { %v1391_v3 = vpop.f32.mrf.mxu0 }
 0x3c1   : > { %v1392_v7 = vadd.f32 %v1646_v16, %v1391_v3 }
 0x3c3   : > { %v1411_v13 = vmax.f32 %v1392_v7, 0.0 }
 0x3c8   : > { %v1394_v22 = vpop.f32.mrf.mxu0 }
 0x3c9   : > { %v1395_v6 = vadd.f32 %v1646_v16, %v1394_v22 }
 0x3cb   : > { %v1412_v8 = vmax.f32 %v1395_v6, 0.0 }
 0x3cd   : > { %1416 = vmatpush.xpose.msra.mxu1 %v1412_v8 }
 0x3d1   : > { %1417 = vmatpush.xpose.msra.mxu1 %v1411_v13 }
 0x3d5   : > { %1418 = vmatpush.xpose.msra.mxu1 %v1410_v17 }
 0x3d9   : > { %1419 = vmatpush.xpose.msra.mxu1 %v1409_v20 }
 0x3dd   : > { %1420 = vmatpush.xpose.msra.mxu1 %v1408_v23 }
 0x3e1   : > { %1421 = vmatpush.xpose.msra.mxu1 %v1407_v24 }
 0x3e5   : > { %1422 = vmatpush.xpose.msra.mxu1 %v1406_v25 }
 0x3e9   : > { %1423 = vmatpush.xpose.msra.mxu1 %v1405_v28 }
 0x3ed   : > { %1424 = vmatpush.xpose.msra.mxu1 %v1404_v29 }
 0x3f1   : > { %1425 = vmatpush.xpose.msra.mxu1 %v1403_v32 }
 0x3f5   : > { %1426 = vmatpush.xpose.msra.mxu1 %v1402_v33 }
 0x3f9   : > { %1427 = vmatpush.xpose.msra.mxu1 %v1401_v34 }
 0x3fd   : > { %1428 = vmatpush.xpose.msra.mxu1 %v1400_v38 }
 0x401   : > { %1429 = vmatpush.xpose.msra.mxu1 %v1399_v39 }
 0x405   : > { %1430 = vmatpush.xpose.msra.mxu1 %v1398_v40 }
 0x409   : > { %1431 = vmatpush.xpose.msra.mxu1 %v1397_v41 }
 0x40c   : > { %1432 = vmatmul.f32.vlgmr.msra.gmra.mxu1 %v1413_v42 }
 0x489   : > { %v1433_v5 = vpop.f32.mrf.mxu1 }
 0x48a   : > { %v1434_v60 = vadd.f32 %v1433_v5, %v1415_v43 }
 0x48c   : > { %1436 = vst [vmem:[%s494_s28] sm:$0x1] %v1434_v60 }
 0x48d   : > { %1704 = shalt.err (!%p1701_p8)
}
 0x48e   : > { %1593 = dma.vmem_to_hbm [thread:$0]  (%p1865_p5), %s1449_s29, 16, %s1451_s10, %s1438_s0  }
 0x48f PF: > { %p1605_p9 = scmp.ge.s32.totalorder %s1743_s18, 2  ;;  %s1462_s23 = sand.u32 1, %s1731_s15  }
 0x490   : > { %s1463_s19 = scalar_lea.sflag [#allocation6], %s1462_s23 }
 0x491   : > { %p1600_p10 = pnand %p1605_p9, %p1869_p6 }
 0x493   : > { %p1601_p11 = pneg %p1600_p10 }
 0x495   : > { %1726 = dma.done.wait (%p1601_p11), %s1463_s19, 16  }
 0x496   : > { %1728 = vsyncadd (%p1601_p11), %s1463_s19, 4294967280  ;;  %s2449_s1 = sld [smem:[#allocation10_spill]]  ;;  %p26_p12 = scmp.ge.s32.totalorder %s1852_s20, 4  }
 0x497   : > { %s2450_s15 = smov %s1735_s16  ;;  %s2451_s16 = smov %s1739_s17 }
 0x498   : > { %s2453_s18 = smov %s1852_s20  ;;  %28 = sbr.rel (!%p26_p12) target bundleno = 9 (0x9), region = 119 }
 0x49c   : > { %s2452_s17 = smov %s2449_s1 }
 0x49d   :  { %1468 = vsyncpa [#allocation5], 1 }
 0x49e   :  { %1470 = vsyncpa [#allocation5 + $0x1], 1 }
 0x49f   :  { %1471 = vsyncpa [#allocation6], 1 }
 0x4a0   :  { %1473 = vsyncpa [#allocation6 + $0x1], 1 }

</bundles_post_ra>
